<compile_context>
chip_gen: v7x
topology: tpu7x:2x2x1
jax: 0.10.0
libtpu: 0.0.40
codegen_flags: <defaults>
</compile_context>

<pallas_src>
import functools
import math

import jax
import jax.numpy as jnp
from jax.experimental import pallas as pl
from jax.experimental.pallas import tpu as pltpu


def _round_up(n, m):
    return ((n + m - 1) // m) * m


# ----------------------------------------------------------------------------------
# Fused kernel: layer1..layer4 (Conv1d + folded eval-BN + LeakyReLU) + global avg pool
# One grid step per batch element; all intermediates stay in VMEM scratch.
# ----------------------------------------------------------------------------------
def _fused_wcnn_kernel(pe_ref, po_ref, w1_ref, s1_ref, w2_ref, s2_ref,
                       w3_ref, s3_ref, w4_ref, s4_ref, o_ref,
                       a1e_ref, a1o_ref, a2_ref, a3_ref,
                       *, l2p, l3p, l4p, l4_valid):

    def lrelu(v):                                  # nn.LeakyReLU() default slope
        return jnp.where(v > 0, v, 0.01 * v)

    # ---- layer1: Conv1d(1->64, K=64, s=2) via patch matmul, parity-split ---------
    a1e_ref[...] = lrelu(
        jnp.dot(pe_ref[0], w1_ref[...], preferred_element_type=jnp.float32)
        + s1_ref[...])
    a1o_ref[...] = lrelu(
        jnp.dot(po_ref[0], w1_ref[...], preferred_element_type=jnp.float32)
        + s1_ref[...])

    # ---- layer2: Conv1d(64->128, K=7, s=2) = 7 accumulated shifted matmuls -------
    # layer1 row (2*l + k) lives at row (l + k//2) of the (k % 2) parity buffer, so
    # every tap is a contiguous sublane slice (no strided loads needed).
    acc = None
    for k in range(7):
        src = a1e_ref if k % 2 == 0 else a1o_ref
        xk = src[pl.ds(k // 2, l2p), :]                       # (l2p, 64)
        t = jnp.dot(xk, w2_ref[k], preferred_element_type=jnp.float32)
        acc = t if acc is None else acc + t
    a2_ref[...] = lrelu(acc + s2_ref[...])

    # ---- layer3: Conv1d(128->256, K=3, s=1) --------------------------------------
    acc = None
    for k in range(3):
        t = jnp.dot(a2_ref[pl.ds(k, l3p), :], w3_ref[k],
                    preferred_element_type=jnp.float32)
        acc = t if acc is None else acc + t
    a3_ref[...] = lrelu(acc + s3_ref[...])

    # ---- layer4: Conv1d(256->256, K=3, s=1) + fused global average pool ----------
    acc = None
    for k in range(3):
        t = jnp.dot(a3_ref[pl.ds(k, l4p), :], w4_ref[k],
                    preferred_element_type=jnp.float32)
        acc = t if acc is None else acc + t
    y4 = lrelu(acc + s4_ref[...])
    row = jax.lax.broadcasted_iota(jnp.int32, y4.shape, 0)
    y4 = jnp.where(row < l4_valid, y4, 0.0)        # drop padded tail rows
    o_ref[0] = jnp.sum(y4, axis=0, keepdims=True) * (1.0 / l4_valid)


# ----------------------------------------------------------------------------------
# Parameter construction / preparation
# ----------------------------------------------------------------------------------
def laplace_fast_weight(out_channels=64, kernel_size=64, eps=0.25,
                        frequency=200000.0 / 3.0):
    """Laplace_fast(mode='sigmoid').forward() -> (out_channels, 1, kernel_size).

    `eps` mirrors the module's nn.Parameter(uniform_(0, 0.5)); fixed to its mean
    for a deterministic example."""
    a = jnp.linspace(0.0, out_channels, out_channels, dtype=jnp.float32).reshape(-1, 1)
    b = jnp.linspace(0.0, out_channels, out_channels, dtype=jnp.float32).reshape(-1, 1)
    t_left = jnp.linspace(-(kernel_size / 2) + 1, -1.0, kernel_size // 2,
                          dtype=jnp.float32)
    t_right = jnp.linspace(0.0, kernel_size / 2 - 1, kernel_size // 2,
                           dtype=jnp.float32)
    p1 = (t_left - b) / (a + eps)
    p2 = (t_right - b) / (a + eps)

    w = math.pi * frequency
    q = 1.0 - 0.03 ** 2

    def lap(p):
        arg = w * (p - 0.1)
        return (1.0 / math.e) * jnp.exp(jax.nn.sigmoid(-0.03 / math.sqrt(q) * arg)) \
            * jnp.sin(arg)

    out = jnp.concatenate([lap(p1), lap(p2)], axis=1)
    return out.reshape(out_channels, 1, kernel_size)


def init_params(key, in_channel=1):
    """Deterministic synthetic parameters matching WCNN_EWK.__init__ shapes."""
    ks = jax.random.split(key, 8)

    def uconv(kw, kb, c_out, c_in, k):
        bound = 1.0 / math.sqrt(c_in * k)
        w = jax.random.uniform(kw, (c_out, c_in, k), jnp.float32, -bound, bound)
        b = jax.random.uniform(kb, (c_out,), jnp.float32, -bound, bound)
        return w, b

    # layer1 conv weight is overwritten by the Laplace_fast wavelet bank
    _, b1 = uconv(ks[0], ks[1], 64, in_channel, 64)
    w1 = laplace_fast_weight(out_channels=64, kernel_size=64, eps=0.25,
                             frequency=200000.0 / 3.0)
    w2, b2 = uconv(ks[2], ks[3], 128, 64, 7)
    w3, b3 = uconv(ks[4], ks[5], 256, 128, 3)
    w4, b4 = uconv(ks[6], ks[7], 256, 256, 3)
    return {"layer1": (w1, b1), "layer2": (w2, b2),
            "layer3": (w3, b3), "layer4": (w4, b4)}


def prepare_params(params, bn_stats=None):
    """Fold eval-mode BatchNorm1d into the conv weights (once, at init time) and lay
    weights out as (K, C_in, C_out) tap matrices for the fused kernel.

    bn_stats: optional dict name -> (gamma, beta, running_mean, running_var, eps) for
    a trained checkpoint.  Defaults to PyTorch BatchNorm1d init (untrained eval mode).
    """
    prepared = {}
    for name, (w, b) in params.items():
        c_out = w.shape[0]
        if bn_stats is not None and name in bn_stats:
            gamma, beta, mean, var, eps = bn_stats[name]
        else:
            gamma = jnp.ones((c_out,), jnp.float32)
            beta = jnp.zeros((c_out,), jnp.float32)
            mean = jnp.zeros((c_out,), jnp.float32)
            var = jnp.ones((c_out,), jnp.float32)
            eps = 1e-5
        scale = gamma / jnp.sqrt(var + eps)                              # (c_out,)
        shift = (beta + (b.astype(jnp.float32) - mean) * scale).reshape(1, c_out)
        # (c_out, c_in, K) -> (K, c_in, c_out), BN scale folded into output channels
        w_taps = jnp.transpose(w, (2, 1, 0)).astype(jnp.float32) * scale[None, None, :]
        prepared[name] = (w_taps, shift.astype(jnp.float32))
    # layer1 has C_in == 1: collapse to a (K, c_out) matrix for the patch matmul.
    w1, s1 = prepared["layer1"]
    prepared["layer1"] = (w1[:, 0, :], s1)
    return prepared


# ----------------------------------------------------------------------------------
# Forward
# ----------------------------------------------------------------------------------
def wcnn_ewk_forward(prepared, x_ncl):
    """Fused WCNN_EWK forward.  x_ncl: (B, 1, L).  Returns (B, 256)."""
    b, c_in, length = x_ncl.shape
    assert c_in == 1, "WCNN_EWK wavelet front-end expects a single input channel"

    # ---- static layer geometry (valid conv) --------------------------------------
    l1 = (length - 64) // 2 + 1          # layer1: K=64, stride=2
    l2 = (l1 - 7) // 2 + 1               # layer2: K=7,  stride=2
    l3 = l2 - 2                          # layer3: K=3,  stride=1
    l4 = l3 - 2                          # layer4: K=3,  stride=1
    assert l4 >= 1, "input signal too short for WCNN_EWK"

    # Padded (multiple-of-8) row counts; each layer computes a few extra rows so the
    # matmuls run on full sublane tiles.  Only the first l4 rows feed the GAP, and all
    # rows that feed it depend exclusively on real (non-padded) data.
    l4p = _round_up(l4, 8)
    l3p = _round_up(l4p + 2, 8)
    l2p = _round_up(l3p + 2, 8)
    m_par = _round_up(l2p + 3, 8)        # rows per parity of the layer1 output

    # ---- layer1 im2col, split by output-position parity (tiny: C_in == 1) --------
    # even rows m -> layer1 output 2m   -> input window start 4m
    # odd  rows m -> layer1 output 2m+1 -> input window start 4m+2
    x2d = x_ncl[:, 0, :].astype(jnp.float32)
    x_need = 4 * (m_par - 1) + 2 + 64
    xp = jnp.pad(x2d, ((0, 0), (0, max(0, x_need - length))))
    starts = jnp.arange(m_par, dtype=jnp.int32)[:, None] * 4
    taps = jnp.arange(64, dtype=jnp.int32)[None, :]
    p_even = xp[:, starts + taps]                 # (B, m_par, 64)
    p_odd = xp[:, starts + 2 + taps]              # (B, m_par, 64)

    w1, s1 = prepared["layer1"]
    w2, s2 = prepared["layer2"]
    w3, s3 = prepared["layer3"]
    w4, s4 = prepared["layer4"]

    kernel = functools.partial(_fused_wcnn_kernel,
                               l2p=l2p, l3p=l3p, l4p=l4p, l4_valid=l4)

    out = pl.pallas_call(
        kernel,
        out_shape=jax.ShapeDtypeStruct((b, 1, 256), jnp.float32),
        grid=(b,),
        in_specs=[
            pl.BlockSpec((1, m_par, 64), lambda i: (i, 0, 0)),   # even patches
            pl.BlockSpec((1, m_par, 64), lambda i: (i, 0, 0)),   # odd patches
            pl.BlockSpec((64, 64), lambda i: (0, 0)),            # w1 (K, Cout), resident
            pl.BlockSpec((1, 64), lambda i: (0, 0)),             # shift1
            pl.BlockSpec((7, 64, 128), lambda i: (0, 0, 0)),     # w2 taps
            pl.BlockSpec((1, 128), lambda i: (0, 0)),            # shift2
            pl.BlockSpec((3, 128, 256), lambda i: (0, 0, 0)),    # w3 taps
            pl.BlockSpec((1, 256), lambda i: (0, 0)),            # shift3
            pl.BlockSpec((3, 256, 256), lambda i: (0, 0, 0)),    # w4 taps
            pl.BlockSpec((1, 256), lambda i: (0, 0)),            # shift4
        ],
        out_specs=pl.BlockSpec((1, 1, 256), lambda i: (i, 0, 0)),
        scratch_shapes=[
            pltpu.VMEM((m_par, 64), jnp.float32),   # layer1 activations, even rows
            pltpu.VMEM((m_par, 64), jnp.float32),   # layer1 activations, odd rows
            pltpu.VMEM((l2p, 128), jnp.float32),    # layer2 activations
            pltpu.VMEM((l3p, 256), jnp.float32),    # layer3 activations
        ],
        compiler_params=pltpu.CompilerParams(
            dimension_semantics=("parallel",)),
    )(p_even, p_odd, w1, s1, w2, s2, w3, s3, w4, s4)

    return out.reshape(b, 256)   # == torch.flatten(gap(x), 1)


if __name__ == "__main__":
    key = jax.random.PRNGKey(0)
    k_x, k_p = jax.random.split(key)

    B, C_IN, L = 2, 1, 256
    x = jax.random.normal(k_x, (B, C_IN, L), dtype=jnp.float32)

    raw_params = init_params(k_p, in_channel=C_IN)
    prepared = prepare_params(raw_params)   # BN folded once, weights laid out as taps

    fwd = jax.jit(wcnn_ewk_forward)
    out = fwd(prepared, x)
    out = jax.block_until_ready(out)

    assert out.shape == (B, 256), out.shape
    assert bool(jnp.all(jnp.isfinite(out)))
    print("KERNEL_OK")
</pallas_src>

<mosaic_0001>
module attributes {stable_mosaic.version = 11 : i64} {
  func.func @_fused_wcnn_kernel(%arg0: i32, %arg1: memref<1x72x64xf32, #tpu.memory_space<vmem>>, %arg2: memref<1x72x64xf32, #tpu.memory_space<vmem>>, %arg3: memref<64x64xf32, #tpu.memory_space<vmem>>, %arg4: memref<1x64xf32, #tpu.memory_space<vmem>>, %arg5: memref<7x64x128xf32, #tpu.memory_space<vmem>>, %arg6: memref<1x128xf32, #tpu.memory_space<vmem>>, %arg7: memref<3x128x256xf32, #tpu.memory_space<vmem>>, %arg8: memref<1x256xf32, #tpu.memory_space<vmem>>, %arg9: memref<3x256x256xf32, #tpu.memory_space<vmem>>, %arg10: memref<1x256xf32, #tpu.memory_space<vmem>>, %arg11: memref<1x1x256xf32, #tpu.memory_space<vmem>>, %arg12: memref<72x64xf32, #tpu.memory_space<vmem>>, %arg13: memref<72x64xf32, #tpu.memory_space<vmem>>, %arg14: memref<64x128xf32, #tpu.memory_space<vmem>>, %arg15: memref<56x256xf32, #tpu.memory_space<vmem>>) attributes {dimension_semantics = [#tpu.dimension_semantics<parallel>], iteration_bounds = array<i64: 2>, scalar_prefetch = 0 : i64, scratch_operands = 4 : i64, tpu.core_type = #tpu.core_type<tc>, window_params = [{transform_indices = @transform_0, window_bounds = array<i64: 1, 72, 64>}, {transform_indices = @transform_1, window_bounds = array<i64: 1, 72, 64>}, {pipeline_mode = #tpu.pipeline_mode<synchronous>, transform_indices = @transform_2, window_bounds = array<i64: 64, 64>}, {pipeline_mode = #tpu.pipeline_mode<synchronous>, transform_indices = @transform_3, window_bounds = array<i64: 1, 64>}, {pipeline_mode = #tpu.pipeline_mode<synchronous>, transform_indices = @transform_4, window_bounds = array<i64: 7, 64, 128>}, {pipeline_mode = #tpu.pipeline_mode<synchronous>, transform_indices = @transform_5, window_bounds = array<i64: 1, 128>}, {pipeline_mode = #tpu.pipeline_mode<synchronous>, transform_indices = @transform_6, window_bounds = array<i64: 3, 128, 256>}, {pipeline_mode = #tpu.pipeline_mode<synchronous>, transform_indices = @transform_7, window_bounds = array<i64: 1, 256>}, {pipeline_mode = #tpu.pipeline_mode<synchronous>, transform_indices = @transform_8, window_bounds = array<i64: 3, 256, 256>}, {pipeline_mode = #tpu.pipeline_mode<synchronous>, transform_indices = @transform_9, window_bounds = array<i64: 1, 256>}, {transform_indices = @transform_10, window_bounds = array<i64: 1, 1, 256>}]} {
    %c0 = arith.constant 0 : index
    %c0_0 = arith.constant 0 : index
    %c0_1 = arith.constant 0 : index
    %0 = vector.load %arg1[%c0, %c0_0, %c0_1] : memref<1x72x64xf32, #tpu.memory_space<vmem>>, vector<1x72x64xf32>
    %1 = vector.shape_cast %0 : vector<1x72x64xf32> to vector<72x64xf32>
    %c0_2 = arith.constant 0 : index
    %c0_3 = arith.constant 0 : index
    %2 = vector.load %arg3[%c0_2, %c0_3] : memref<64x64xf32, #tpu.memory_space<vmem>>, vector<64x64xf32>
    %cst = arith.constant dense<0.000000e+00> : vector<72x64xf32>
    %3 = tpu.matmul %1, %2, %cst {dimension_numbers = #tpu.dot_dimension_numbers<[1], [0], [0], [1], [0, 0, 1, 1], [], []>} : vector<72x64xf32>, vector<64x64xf32>, vector<72x64xf32> -> vector<72x64xf32>
    %c0_4 = arith.constant 0 : index
    %c0_5 = arith.constant 0 : index
    %4 = vector.load %arg4[%c0_4, %c0_5] : memref<1x64xf32, #tpu.memory_space<vmem>>, vector<1x64xf32>
    %5 = vector.broadcast %4 : vector<1x64xf32> to vector<72x64xf32>
    %6 = arith.addf %3, %5 : vector<72x64xf32>
    %cst_6 = arith.constant 0.000000e+00 : f32
    %7 = vector.broadcast %cst_6 : f32 to vector<72x64xf32>
    %8 = arith.cmpf ogt, %6, %7 : vector<72x64xf32>
    %cst_7 = arith.constant 0.00999999977 : f32
    %9 = vector.broadcast %cst_7 : f32 to vector<72x64xf32>
    %10 = arith.mulf %9, %6 : vector<72x64xf32>
    %11 = arith.select %8, %6, %10 : vector<72x64xi1>, vector<72x64xf32>
    %c0_8 = arith.constant 0 : index
    %c0_9 = arith.constant 0 : index
    %12 = vector.load %arg12[%c0_8, %c0_9] : memref<72x64xf32, #tpu.memory_space<vmem>>, vector<72x64xf32>
    tpu.vector_store %arg12[%c0_8, %c0_9], %11 {strides = array<i32>} : memref<72x64xf32, #tpu.memory_space<vmem>>, vector<72x64xf32>,
    %c0_10 = arith.constant 0 : index
    %c0_11 = arith.constant 0 : index
    %c0_12 = arith.constant 0 : index
    %13 = vector.load %arg2[%c0_10, %c0_11, %c0_12] : memref<1x72x64xf32, #tpu.memory_space<vmem>>, vector<1x72x64xf32>
    %14 = vector.shape_cast %13 : vector<1x72x64xf32> to vector<72x64xf32>
    %c0_13 = arith.constant 0 : index
    %c0_14 = arith.constant 0 : index
    %15 = vector.load %arg3[%c0_13, %c0_14] : memref<64x64xf32, #tpu.memory_space<vmem>>, vector<64x64xf32>
    %cst_15 = arith.constant dense<0.000000e+00> : vector<72x64xf32>
    %16 = tpu.matmul %14, %15, %cst_15 {dimension_numbers = #tpu.dot_dimension_numbers<[1], [0], [0], [1], [0, 0, 1, 1], [], []>} : vector<72x64xf32>, vector<64x64xf32>, vector<72x64xf32> -> vector<72x64xf32>
    %c0_16 = arith.constant 0 : index
    %c0_17 = arith.constant 0 : index
    %17 = vector.load %arg4[%c0_16, %c0_17] : memref<1x64xf32, #tpu.memory_space<vmem>>, vector<1x64xf32>
    %18 = vector.broadcast %17 : vector<1x64xf32> to vector<72x64xf32>
    %19 = arith.addf %16, %18 : vector<72x64xf32>
    %cst_18 = arith.constant 0.000000e+00 : f32
    %20 = vector.broadcast %cst_18 : f32 to vector<72x64xf32>
    %21 = arith.cmpf ogt, %19, %20 : vector<72x64xf32>
    %cst_19 = arith.constant 0.00999999977 : f32
    %22 = vector.broadcast %cst_19 : f32 to vector<72x64xf32>
    %23 = arith.mulf %22, %19 : vector<72x64xf32>
    %24 = arith.select %21, %19, %23 : vector<72x64xi1>, vector<72x64xf32>
    %c0_20 = arith.constant 0 : index
    %c0_21 = arith.constant 0 : index
    %25 = vector.load %arg13[%c0_20, %c0_21] : memref<72x64xf32, #tpu.memory_space<vmem>>, vector<72x64xf32>
    tpu.vector_store %arg13[%c0_20, %c0_21], %24 {strides = array<i32>} : memref<72x64xf32, #tpu.memory_space<vmem>>, vector<72x64xf32>,
    %c0_22 = arith.constant 0 : index
    %c0_23 = arith.constant 0 : index
    %26 = vector.load %arg12[%c0_22, %c0_23] : memref<72x64xf32, #tpu.memory_space<vmem>>, vector<64x64xf32>
    %c0_24 = arith.constant 0 : index
    %c0_25 = arith.constant 0 : index
    %c0_26 = arith.constant 0 : index
    %27 = vector.load %arg5[%c0_24, %c0_25, %c0_26] : memref<7x64x128xf32, #tpu.memory_space<vmem>>, vector<1x64x128xf32>
    %28 = vector.shape_cast %27 : vector<1x64x128xf32> to vector<64x128xf32>
    %cst_27 = arith.constant dense<0.000000e+00> : vector<64x128xf32>
    %29 = tpu.matmul %26, %28, %cst_27 {dimension_numbers = #tpu.dot_dimension_numbers<[1], [0], [0], [1], [0, 0, 1, 1], [], []>} : vector<64x64xf32>, vector<64x128xf32>, vector<64x128xf32> -> vector<64x128xf32>
    %c0_28 = arith.constant 0 : index
    %c0_29 = arith.constant 0 : index
    %30 = vector.load %arg13[%c0_28, %c0_29] : memref<72x64xf32, #tpu.memory_space<vmem>>, vector<64x64xf32>
    %c1 = arith.constant 1 : index
    %c0_30 = arith.constant 0 : index
    %c0_31 = arith.constant 0 : index
    %31 = vector.load %arg5[%c1, %c0_30, %c0_31] : memref<7x64x128xf32, #tpu.memory_space<vmem>>, vector<1x64x128xf32>
    %32 = vector.shape_cast %31 : vector<1x64x128xf32> to vector<64x128xf32>
    %cst_32 = arith.constant dense<0.000000e+00> : vector<64x128xf32>
    %33 = tpu.matmul %30, %32, %cst_32 {dimension_numbers = #tpu.dot_dimension_numbers<[1], [0], [0], [1], [0, 0, 1, 1], [], []>} : vector<64x64xf32>, vector<64x128xf32>, vector<64x128xf32> -> vector<64x128xf32>
    %34 = arith.addf %29, %33 : vector<64x128xf32>
    %c1_33 = arith.constant 1 : index
    %c0_34 = arith.constant 0 : index
    %35 = vector.load %arg12[%c1_33, %c0_34] : memref<72x64xf32, #tpu.memory_space<vmem>>, vector<64x64xf32>
    %c2 = arith.constant 2 : index
    %c0_35 = arith.constant 0 : index
    %c0_36 = arith.constant 0 : index
    %36 = vector.load %arg5[%c2, %c0_35, %c0_36] : memref<7x64x128xf32, #tpu.memory_space<vmem>>, vector<1x64x128xf32>
    %37 = vector.shape_cast %36 : vector<1x64x128xf32> to vector<64x128xf32>
    %cst_37 = arith.constant dense<0.000000e+00> : vector<64x128xf32>
    %38 = tpu.matmul %35, %37, %cst_37 {dimension_numbers = #tpu.dot_dimension_numbers<[1], [0], [0], [1], [0, 0, 1, 1], [], []>} : vector<64x64xf32>, vector<64x128xf32>, vector<64x128xf32> -> vector<64x128xf32>
    %39 = arith.addf %34, %38 : vector<64x128xf32>
    %c1_38 = arith.constant 1 : index
    %c0_39 = arith.constant 0 : index
    %40 = vector.load %arg13[%c1_38, %c0_39] : memref<72x64xf32, #tpu.memory_space<vmem>>, vector<64x64xf32>
    %c3 = arith.constant 3 : index
    %c0_40 = arith.constant 0 : index
    %c0_41 = arith.constant 0 : index
    %41 = vector.load %arg5[%c3, %c0_40, %c0_41] : memref<7x64x128xf32, #tpu.memory_space<vmem>>, vector<1x64x128xf32>
    %42 = vector.shape_cast %41 : vector<1x64x128xf32> to vector<64x128xf32>
    %cst_42 = arith.constant dense<0.000000e+00> : vector<64x128xf32>
    %43 = tpu.matmul %40, %42, %cst_42 {dimension_numbers = #tpu.dot_dimension_numbers<[1], [0], [0], [1], [0, 0, 1, 1], [], []>} : vector<64x64xf32>, vector<64x128xf32>, vector<64x128xf32> -> vector<64x128xf32>
    %44 = arith.addf %39, %43 : vector<64x128xf32>
    %c2_43 = arith.constant 2 : index
    %c0_44 = arith.constant 0 : index
    %45 = vector.load %arg12[%c2_43, %c0_44] : memref<72x64xf32, #tpu.memory_space<vmem>>, vector<64x64xf32>
    %c4 = arith.constant 4 : index
    %c0_45 = arith.constant 0 : index
    %c0_46 = arith.constant 0 : index
    %46 = vector.load %arg5[%c4, %c0_45, %c0_46] : memref<7x64x128xf32, #tpu.memory_space<vmem>>, vector<1x64x128xf32>
    %47 = vector.shape_cast %46 : vector<1x64x128xf32> to vector<64x128xf32>
    %cst_47 = arith.constant dense<0.000000e+00> : vector<64x128xf32>
    %48 = tpu.matmul %45, %47, %cst_47 {dimension_numbers = #tpu.dot_dimension_numbers<[1], [0], [0], [1], [0, 0, 1, 1], [], []>} : vector<64x64xf32>, vector<64x128xf32>, vector<64x128xf32> -> vector<64x128xf32>
    %49 = arith.addf %44, %48 : vector<64x128xf32>
    %c2_48 = arith.constant 2 : index
    %c0_49 = arith.constant 0 : index
    %50 = vector.load %arg13[%c2_48, %c0_49] : memref<72x64xf32, #tpu.memory_space<vmem>>, vector<64x64xf32>
    %c5 = arith.constant 5 : index
    %c0_50 = arith.constant 0 : index
    %c0_51 = arith.constant 0 : index
    %51 = vector.load %arg5[%c5, %c0_50, %c0_51] : memref<7x64x128xf32, #tpu.memory_space<vmem>>, vector<1x64x128xf32>
    %52 = vector.shape_cast %51 : vector<1x64x128xf32> to vector<64x128xf32>
    %cst_52 = arith.constant dense<0.000000e+00> : vector<64x128xf32>
    %53 = tpu.matmul %50, %52, %cst_52 {dimension_numbers = #tpu.dot_dimension_numbers<[1], [0], [0], [1], [0, 0, 1, 1], [], []>} : vector<64x64xf32>, vector<64x128xf32>, vector<64x128xf32> -> vector<64x128xf32>
    %54 = arith.addf %49, %53 : vector<64x128xf32>
    %c3_53 = arith.constant 3 : index
    %c0_54 = arith.constant 0 : index
    %55 = vector.load %arg12[%c3_53, %c0_54] : memref<72x64xf32, #tpu.memory_space<vmem>>, vector<64x64xf32>
    %c6 = arith.constant 6 : index
    %c0_55 = arith.constant 0 : index
    %c0_56 = arith.constant 0 : index
    %56 = vector.load %arg5[%c6, %c0_55, %c0_56] : memref<7x64x128xf32, #tpu.memory_space<vmem>>, vector<1x64x128xf32>
    %57 = vector.shape_cast %56 : vector<1x64x128xf32> to vector<64x128xf32>
    %cst_57 = arith.constant dense<0.000000e+00> : vector<64x128xf32>
    %58 = tpu.matmul %55, %57, %cst_57 {dimension_numbers = #tpu.dot_dimension_numbers<[1], [0], [0], [1], [0, 0, 1, 1], [], []>} : vector<64x64xf32>, vector<64x128xf32>, vector<64x128xf32> -> vector<64x128xf32>
    %59 = arith.addf %54, %58 : vector<64x128xf32>
    %c0_58 = arith.constant 0 : index
    %c0_59 = arith.constant 0 : index
    %60 = vector.load %arg6[%c0_58, %c0_59] : memref<1x128xf32, #tpu.memory_space<vmem>>, vector<1x128xf32>
    %61 = vector.broadcast %60 : vector<1x128xf32> to vector<64x128xf32>
    %62 = arith.addf %59, %61 : vector<64x128xf32>
    %cst_60 = arith.constant 0.000000e+00 : f32
    %63 = vector.broadcast %cst_60 : f32 to vector<64x128xf32>
    %64 = arith.cmpf ogt, %62, %63 : vector<64x128xf32>
    %cst_61 = arith.constant 0.00999999977 : f32
    %65 = vector.broadcast %cst_61 : f32 to vector<64x128xf32>
    %66 = arith.mulf %65, %62 : vector<64x128xf32>
    %67 = arith.select %64, %62, %66 : vector<64x128xi1>, vector<64x128xf32>
    %c0_62 = arith.constant 0 : index
    %c0_63 = arith.constant 0 : index
    %68 = vector.load %arg14[%c0_62, %c0_63] : memref<64x128xf32, #tpu.memory_space<vmem>>, vector<64x128xf32>
    tpu.vector_store %arg14[%c0_62, %c0_63], %67 {strides = array<i32>} : memref<64x128xf32, #tpu.memory_space<vmem>>, vector<64x128xf32>,
    %c0_64 = arith.constant 0 : index
    %c0_65 = arith.constant 0 : index
    %69 = vector.load %arg14[%c0_64, %c0_65] : memref<64x128xf32, #tpu.memory_space<vmem>>, vector<56x128xf32>
    %c0_66 = arith.constant 0 : index
    %c0_67 = arith.constant 0 : index
    %c0_68 = arith.constant 0 : index
    %70 = vector.load %arg7[%c0_66, %c0_67, %c0_68] : memref<3x128x256xf32, #tpu.memory_space<vmem>>, vector<1x128x256xf32>
    %71 = vector.shape_cast %70 : vector<1x128x256xf32> to vector<128x256xf32>
    %cst_69 = arith.constant dense<0.000000e+00> : vector<56x256xf32>
    %72 = tpu.matmul %69, %71, %cst_69 {dimension_numbers = #tpu.dot_dimension_numbers<[1], [0], [0], [1], [0, 0, 1, 1], [], []>} : vector<56x128xf32>, vector<128x256xf32>, vector<56x256xf32> -> vector<56x256xf32>
    %c1_70 = arith.constant 1 : index
    %c0_71 = arith.constant 0 : index
    %73 = vector.load %arg14[%c1_70, %c0_71] : memref<64x128xf32, #tpu.memory_space<vmem>>, vector<56x128xf32>
    %c1_72 = arith.constant 1 : index
    %c0_73 = arith.constant 0 : index
    %c0_74 = arith.constant 0 : index
    %74 = vector.load %arg7[%c1_72, %c0_73, %c0_74] : memref<3x128x256xf32, #tpu.memory_space<vmem>>, vector<1x128x256xf32>
    %75 = vector.shape_cast %74 : vector<1x128x256xf32> to vector<128x256xf32>
    %cst_75 = arith.constant dense<0.000000e+00> : vector<56x256xf32>
    %76 = tpu.matmul %73, %75, %cst_75 {dimension_numbers = #tpu.dot_dimension_numbers<[1], [0], [0], [1], [0, 0, 1, 1], [], []>} : vector<56x128xf32>, vector<128x256xf32>, vector<56x256xf32> -> vector<56x256xf32>
    %77 = arith.addf %72, %76 : vector<56x256xf32>
    %c2_76 = arith.constant 2 : index
    %c0_77 = arith.constant 0 : index
    %78 = vector.load %arg14[%c2_76, %c0_77] : memref<64x128xf32, #tpu.memory_space<vmem>>, vector<56x128xf32>
    %c2_78 = arith.constant 2 : index
    %c0_79 = arith.constant 0 : index
    %c0_80 = arith.constant 0 : index
    %79 = vector.load %arg7[%c2_78, %c0_79, %c0_80] : memref<3x128x256xf32, #tpu.memory_space<vmem>>, vector<1x128x256xf32>
    %80 = vector.shape_cast %79 : vector<1x128x256xf32> to vector<128x256xf32>
    %cst_81 = arith.constant dense<0.000000e+00> : vector<56x256xf32>
    %81 = tpu.matmul %78, %80, %cst_81 {dimension_numbers = #tpu.dot_dimension_numbers<[1], [0], [0], [1], [0, 0, 1, 1], [], []>} : vector<56x128xf32>, vector<128x256xf32>, vector<56x256xf32> -> vector<56x256xf32>
    %82 = arith.addf %77, %81 : vector<56x256xf32>
    %c0_82 = arith.constant 0 : index
    %c0_83 = arith.constant 0 : index
    %83 = vector.load %arg8[%c0_82, %c0_83] : memref<1x256xf32, #tpu.memory_space<vmem>>, vector<1x256xf32>
    %84 = vector.broadcast %83 : vector<1x256xf32> to vector<56x256xf32>
    %85 = arith.addf %82, %84 : vector<56x256xf32>
    %cst_84 = arith.constant 0.000000e+00 : f32
    %86 = vector.broadcast %cst_84 : f32 to vector<56x256xf32>
    %87 = arith.cmpf ogt, %85, %86 : vector<56x256xf32>
    %cst_85 = arith.constant 0.00999999977 : f32
    %88 = vector.broadcast %cst_85 : f32 to vector<56x256xf32>
    %89 = arith.mulf %88, %85 : vector<56x256xf32>
    %90 = arith.select %87, %85, %89 : vector<56x256xi1>, vector<56x256xf32>
    %c0_86 = arith.constant 0 : index
    %c0_87 = arith.constant 0 : index
    %91 = vector.load %arg15[%c0_86, %c0_87] : memref<56x256xf32, #tpu.memory_space<vmem>>, vector<56x256xf32>
    tpu.vector_store %arg15[%c0_86, %c0_87], %90 {strides = array<i32>} : memref<56x256xf32, #tpu.memory_space<vmem>>, vector<56x256xf32>,
    %c0_88 = arith.constant 0 : index
    %c0_89 = arith.constant 0 : index
    %92 = vector.load %arg15[%c0_88, %c0_89] : memref<56x256xf32, #tpu.memory_space<vmem>>, vector<48x256xf32>
    %c0_90 = arith.constant 0 : index
    %c0_91 = arith.constant 0 : index
    %c0_92 = arith.constant 0 : index
    %93 = vector.load %arg9[%c0_90, %c0_91, %c0_92] : memref<3x256x256xf32, #tpu.memory_space<vmem>>, vector<1x256x256xf32>
    %94 = vector.shape_cast %93 : vector<1x256x256xf32> to vector<256x256xf32>
    %cst_93 = arith.constant dense<0.000000e+00> : vector<48x256xf32>
    %95 = tpu.matmul %92, %94, %cst_93 {dimension_numbers = #tpu.dot_dimension_numbers<[1], [0], [0], [1], [0, 0, 1, 1], [], []>} : vector<48x256xf32>, vector<256x256xf32>, vector<48x256xf32> -> vector<48x256xf32>
    %c1_94 = arith.constant 1 : index
    %c0_95 = arith.constant 0 : index
    %96 = vector.load %arg15[%c1_94, %c0_95] : memref<56x256xf32, #tpu.memory_space<vmem>>, vector<48x256xf32>
    %c1_96 = arith.constant 1 : index
    %c0_97 = arith.constant 0 : index
    %c0_98 = arith.constant 0 : index
    %97 = vector.load %arg9[%c1_96, %c0_97, %c0_98] : memref<3x256x256xf32, #tpu.memory_space<vmem>>, vector<1x256x256xf32>
    %98 = vector.shape_cast %97 : vector<1x256x256xf32> to vector<256x256xf32>
    %cst_99 = arith.constant dense<0.000000e+00> : vector<48x256xf32>
    %99 = tpu.matmul %96, %98, %cst_99 {dimension_numbers = #tpu.dot_dimension_numbers<[1], [0], [0], [1], [0, 0, 1, 1], [], []>} : vector<48x256xf32>, vector<256x256xf32>, vector<48x256xf32> -> vector<48x256xf32>
    %100 = arith.addf %95, %99 : vector<48x256xf32>
    %c2_100 = arith.constant 2 : index
    %c0_101 = arith.constant 0 : index
    %101 = vector.load %arg15[%c2_100, %c0_101] : memref<56x256xf32, #tpu.memory_space<vmem>>, vector<48x256xf32>
    %c2_102 = arith.constant 2 : index
    %c0_103 = arith.constant 0 : index
    %c0_104 = arith.constant 0 : index
    %102 = vector.load %arg9[%c2_102, %c0_103, %c0_104] : memref<3x256x256xf32, #tpu.memory_space<vmem>>, vector<1x256x256xf32>
    %103 = vector.shape_cast %102 : vector<1x256x256xf32> to vector<256x256xf32>
    %cst_105 = arith.constant dense<0.000000e+00> : vector<48x256xf32>
    %104 = tpu.matmul %101, %103, %cst_105 {dimension_numbers = #tpu.dot_dimension_numbers<[1], [0], [0], [1], [0, 0, 1, 1], [], []>} : vector<48x256xf32>, vector<256x256xf32>, vector<48x256xf32> -> vector<48x256xf32>
    %105 = arith.addf %100, %104 : vector<48x256xf32>
    %c0_106 = arith.constant 0 : index
    %c0_107 = arith.constant 0 : index
    %106 = vector.load %arg10[%c0_106, %c0_107] : memref<1x256xf32, #tpu.memory_space<vmem>>, vector<1x256xf32>
    %107 = vector.broadcast %106 : vector<1x256xf32> to vector<48x256xf32>
    %108 = arith.addf %105, %107 : vector<48x256xf32>
    %cst_108 = arith.constant 0.000000e+00 : f32
    %109 = vector.broadcast %cst_108 : f32 to vector<48x256xf32>
    %110 = arith.cmpf ogt, %108, %109 : vector<48x256xf32>
    %cst_109 = arith.constant 0.00999999977 : f32
    %111 = vector.broadcast %cst_109 : f32 to vector<48x256xf32>
    %112 = arith.mulf %111, %108 : vector<48x256xf32>
    %113 = arith.select %110, %108, %112 : vector<48x256xi1>, vector<48x256xf32>
    %114 = tpu.iota {dimensions = array<i32: 0>} : vector<48x256xi32>
    %c42_i32 = arith.constant 42 : i32
    %115 = vector.broadcast %c42_i32 : i32 to vector<48x256xi32>
    %116 = arith.cmpi slt, %114, %115 : vector<48x256xi32>
    %cst_110 = arith.constant 0.000000e+00 : f32
    %117 = vector.broadcast %cst_110 : f32 to vector<48x256xf32>
    %118 = arith.select %116, %113, %117 : vector<48x256xi1>, vector<48x256xf32>
    %cst_111 = arith.constant dense<0.000000e+00> : vector<256xf32>
    %119 = vector.multi_reduction <add>, %118, %cst_111 [0] : vector<48x256xf32> to vector<256xf32>
    %120 = vector.shape_cast %119 : vector<256xf32> to vector<1x256xf32>
    %cst_112 = arith.constant 0.0238095243 : f32
    %121 = vector.broadcast %cst_112 : f32 to vector<1x256xf32>
    %122 = arith.mulf %120, %121 : vector<1x256xf32>
    %c0_113 = arith.constant 0 : index
    %c0_114 = arith.constant 0 : index
    %c0_115 = arith.constant 0 : index
    %123 = vector.load %arg11[%c0_113, %c0_114, %c0_115] : memref<1x1x256xf32, #tpu.memory_space<vmem>>, vector<1x1x256xf32>
    %124 = vector.shape_cast %123 : vector<1x1x256xf32> to vector<1x256xf32>
    %125 = vector.shape_cast %122 : vector<1x256xf32> to vector<1x1x256xf32>
    tpu.vector_store %arg11[%c0_113, %c0_114, %c0_115], %125 {strides = array<i32>} : memref<1x1x256xf32, #tpu.memory_space<vmem>>, vector<1x1x256xf32>,
    return
  }
  func.func @transform_0(%arg0: i32) -> (i32, i32, i32) {
    %c0_i32 = arith.constant 0 : i32
    %c0_i32_0 = arith.constant 0 : i32
    %c0_i32_1 = arith.constant 0 : i32
    return %arg0, %c0_i32, %c0_i32_0 : i32, i32, i32
  }
  func.func @transform_1(%arg0: i32) -> (i32, i32, i32) {
    %c0_i32 = arith.constant 0 : i32
    %c0_i32_0 = arith.constant 0 : i32
    %c0_i32_1 = arith.constant 0 : i32
    return %arg0, %c0_i32, %c0_i32_0 : i32, i32, i32
  }
  func.func @transform_2(%arg0: i32) -> (i32, i32) {
    %c0_i32 = arith.constant 0 : i32
    %c0_i32_0 = arith.constant 0 : i32
    %c0_i32_1 = arith.constant 0 : i32
    return %c0_i32, %c0_i32_0 : i32, i32
  }
  func.func @transform_3(%arg0: i32) -> (i32, i32) {
    %c0_i32 = arith.constant 0 : i32
    %c0_i32_0 = arith.constant 0 : i32
    %c0_i32_1 = arith.constant 0 : i32
    return %c0_i32, %c0_i32_0 : i32, i32
  }
  func.func @transform_4(%arg0: i32) -> (i32, i32, i32) {
    %c0_i32 = arith.constant 0 : i32
    %c0_i32_0 = arith.constant 0 : i32
    %c0_i32_1 = arith.constant 0 : i32
    %c0_i32_2 = arith.constant 0 : i32
    return %c0_i32, %c0_i32_0, %c0_i32_1 : i32, i32, i32
  }
  func.func @transform_5(%arg0: i32) -> (i32, i32) {
    %c0_i32 = arith.constant 0 : i32
    %c0_i32_0 = arith.constant 0 : i32
    %c0_i32_1 = arith.constant 0 : i32
    return %c0_i32, %c0_i32_0 : i32, i32
  }
  func.func @transform_6(%arg0: i32) -> (i32, i32, i32) {
    %c0_i32 = arith.constant 0 : i32
    %c0_i32_0 = arith.constant 0 : i32
    %c0_i32_1 = arith.constant 0 : i32
    %c0_i32_2 = arith.constant 0 : i32
    return %c0_i32, %c0_i32_0, %c0_i32_1 : i32, i32, i32
  }
  func.func @transform_7(%arg0: i32) -> (i32, i32) {
    %c0_i32 = arith.constant 0 : i32
    %c0_i32_0 = arith.constant 0 : i32
    %c0_i32_1 = arith.constant 0 : i32
    return %c0_i32, %c0_i32_0 : i32, i32
  }
  func.func @transform_8(%arg0: i32) -> (i32, i32, i32) {
    %c0_i32 = arith.constant 0 : i32
    %c0_i32_0 = arith.constant 0 : i32
    %c0_i32_1 = arith.constant 0 : i32
    %c0_i32_2 = arith.constant 0 : i32
    return %c0_i32, %c0_i32_0, %c0_i32_1 : i32, i32, i32
  }
  func.func @transform_9(%arg0: i32) -> (i32, i32) {
    %c0_i32 = arith.constant 0 : i32
    %c0_i32_0 = arith.constant 0 : i32
    %c0_i32_1 = arith.constant 0 : i32
    return %c0_i32, %c0_i32_0 : i32, i32
  }
  func.func @transform_10(%arg0: i32) -> (i32, i32, i32) {
    %c0_i32 = arith.constant 0 : i32
    %c0_i32_0 = arith.constant 0 : i32
    %c0_i32_1 = arith.constant 0 : i32
    return %arg0, %c0_i32, %c0_i32_0 : i32, i32, i32
  }
}

</mosaic_0001>

<bundles_post_ra>
// kernel: wcnn_ewk_forward.1
= control target key start
LH: loop header
LB: loop body
LE: loop exit
PB: predicated region body
PF: predicated region fallthrough
CT: control target
= control target key end

     0   :  { %s4616_s13 = smov 0   ;;  %s6209_s0 = inlined_call_operand.vmem [shape: f32[2,72,64], index: 0, kind: input, shape index: {}]   ;;  %s6210_s1 = inlined_call_operand.vmem [shape: f32[2,72,64], index: 1, kind: input, shape index: {}]   ;;  %s6211_s2 = inlined_call_operand.vmem [shape: f32[64,64], index: 2, kind: input, shape index: {}]   ;;  %s6212_s3 = inlined_call_operand.vmem [shape: f32[1,64], index: 3, kind: input, shape index: {}]   ;;  %s6213_s4 = inlined_call_operand.vmem [shape: f32[7,64,128], index: 4, kind: input, shape index: {}]   ;;  %s6214_s5 = inlined_call_operand.vmem [shape: f32[1,128], index: 5, kind: input, shape index: {}]   ;;  %s6215_s6 = inlined_call_operand.vmem [shape: f32[3,128,256], index: 6, kind: input, shape index: {}]   ;;  %s6216_s7 = inlined_call_operand.vmem [shape: f32[1,256], index: 7, kind: input, shape index: {}]   ;;  %s6217_s8 = inlined_call_operand.vmem [shape: f32[3,256,256], index: 8, kind: input, shape index: {}]   ;;  %s6218_s9 = inlined_call_operand.vmem [shape: f32[1,256], index: 9, kind: input, shape index: {}]   ;;  %s6219_s10 = inlined_call_operand.vmem [shape: f32[2,1,256], index: 10, kind: output, shape index: {}]  }
   0x1 LB: > { %s3249_s14 = sadd.s32 4294967295, %s4555_s13   ;;  %p3253_p0 = scmp.ge.s32.totalorder %s4555_s13, 1  ;;  %s4555_s13 = sphi %s4616_s13, %s20_s13  }
   0x2   : > { %p322_p1 = scmp.lt.s32.totalorder %s4555_s13, 3 }
   0x4   : > { %p323_p2 = pnand %p3253_p0, %p322_p1 }
   0x5   : > { %v387_v0 = vld [vmem:[%s6211_s2] sm:$0xff] (!%p323_p2)  ;;  %v388_v1 = vld [vmem:[%s6211_s2 + $0x8] sm:$0xff] (!%p323_p2)  ;;  %v389_v2 = vld [vmem:[%s6211_s2 + $0x10] sm:$0xff] (!%p323_p2)  ;;  %v4557_v3 = vmov (!%p323_p2), 0.0|0.0   ;;  %vm4558_vm0 = vmmov (!%p323_p2), 0   ;;  %v4559_v6 = vmov (!%p323_p2), 0.0  }
   0x6   : > { %326 = sbr.rel (%p323_p2) target bundleno = 1218 (0x4c2), region = 60  ;;  %4004 = vmatprep.subr.bf16.mxu0 (!%p323_p2), %v4557_v3  ;;  %v4005_v4 = vpack.c.bf16 (!%p323_p2), %v388_v1, %v387_v0  ;;  %v390_v5 = vld [vmem:[%s6211_s2 + $0x18] sm:$0xff] (!%p323_p2)  ;;  %3738 = vmatprep.mubr.msk.f32.mxu0 (!%p323_p2), %vm4558_vm0, %v4559_v6  ;;  %p364_p3 = scmp.lt.s32.totalorder (!%p323_p2), %s3249_s14, 1  ;;  %v391_v8 = vld [vmem:[%s6211_s2 + $0x20] sm:$0xff] (!%p323_p2)  ;;  %v392_v9 = vld [vmem:[%s6211_s2 + $0x28] sm:$0xff] (!%p323_p2)  ;;  %vm402_vm1 = vcmask (!%p323_p2), 523264  }
   0x7   : > { %4428 = vmatprep.subr.bf16.mxu1 (!%p323_p2), %v4557_v3  ;;  %3784 = vmatprep.mubr.msk.f32.mxu1 (!%p323_p2), %vm4558_vm0, %v4559_v6  ;;  %v4008_v7 = vpack.c.bf16 (!%p323_p2), %v390_v5, %v389_v2  ;;  %v4011_v10 = vpack.c.bf16 (!%p323_p2), %v392_v9, %v391_v8  ;;  %v393_v11 = vld [vmem:[%s6211_s2 + $0x30] sm:$0xff] (!%p323_p2)  ;;  %v394_v12 = vld [vmem:[%s6211_s2 + $0x38] sm:$0xff] (!%p323_p2)  ;;  %v3277_v32 = vld [vmem:[%s6213_s4 + $0x40] sm:$0xff] (!%p323_p2) }
   0x8   : > { %4006 = vmatpush3.bf16.msra.mxu0 (!%p323_p2), %v4005_v4  ;;  %4432 = vmatpush3.bf16.msra.mxu1 (!%p323_p2), %v4005_v4  ;;  %v4014_v13 = vpack.c.bf16 (!%p323_p2), %v394_v12, %v393_v11  ;;  %v3278_v33 = vld [vmem:[%s6213_s4 + $0x48] sm:$0xff] (!%p323_p2)  ;;  %v3279_v35 = vld [vmem:[%s6213_s4 + $0x50] sm:$0xff] (!%p323_p2)  ;;  %v3280_v36 = vld [vmem:[%s6213_s4 + $0x58] sm:$0xff] (!%p323_p2) }
   0x9   : > { %4007 = vmatprep.subr.bf16.mxu0 (!%p323_p2), %v4557_v3  ;;  %4429 = vmatprep.subr.bf16.mxu1 (!%p323_p2), %v4557_v3  ;;  %v4028_v34 = vpack.c.bf16 (!%p323_p2), %v3278_v33, %v3277_v32  ;;  %v4032_v37 = vpack.c.bf16 (!%p323_p2), %v3280_v36, %v3279_v35  ;;  %v3281_v38 = vld [vmem:[%s6213_s4 + $0x60] sm:$0xff] (!%p323_p2)  ;;  %v3282_v39 = vld [vmem:[%s6213_s4 + $0x68] sm:$0xff] (!%p323_p2)  ;;  %v3283_v41 = vld [vmem:[%s6213_s4 + $0x70] sm:$0xff] (!%p323_p2) }
   0xa   : > { %v4036_v40 = vpack.c.bf16 (!%p323_p2), %v3282_v39, %v3281_v38  ;;  %v3284_v42 = vld [vmem:[%s6213_s4 + $0x78] sm:$0xff] (!%p323_p2)  ;;  %v781_v44 = vld [vmem:[%s6213_s4] sm:$0xff] (!%p323_p2)  ;;  %v782_v45 = vld [vmem:[%s6213_s4 + $0x8] sm:$0xff] (!%p323_p2) }
   0xb   : > { %v4040_v43 = vpack.c.bf16 (!%p323_p2), %v3284_v42, %v3283_v41  ;;  %v4764_v46 = vpack.c.bf16 (!%p323_p2), %v782_v45, %v781_v44  ;;  %v4770_v47 = vld [vmem:[%s6212_s3] ss:$0 sm:$0xff] (!%p323_p2) }
   0xc   : > { %4009 = vmatpush3.bf16.msra.mxu0 (!%p323_p2), %v4008_v7  ;;  %4433 = vmatpush3.bf16.msra.mxu1 (!%p323_p2), %v4008_v7 }
   0xd   : > { %s6221_s14 = smov (!%p364_p3, %s3249_s14), 1  ;;  %4010 = vmatprep.subr.bf16.mxu0 %v4557_v3  ;;  %4430 = vmatprep.subr.bf16.mxu1 %v4557_v3 }
   0xe   : > { %s4536_s11 = smul.u32 72, %s6221_s14  ;;  %s3256_s12 = sshll.u32 %s6221_s14, 1 }
   0xf   : > { %s377_s17 = scalar_lea.vmem %s6219_s10, %s3256_s12 }
  0x10   : > { %4012 = vmatpush3.bf16.msra.mxu0 %v4011_v10  ;;  %4434 = vmatpush3.bf16.msra.mxu1 %v4011_v10  ;;  %s4658_s16 = scalar_lea.vmem %s6209_s0, %s4536_s11  ;;  %s4663_s19 = scalar_lea.vmem %s6210_s1, %s4536_s11 }
  0x11   : > { %4013 = vmatprep.subr.bf16.mxu0 %v4557_v3  ;;  %4431 = vmatprep.subr.bf16.mxu1 %v4557_v3  ;;  %v378_v14 = vld [vmem:[%s4658_s16] sm:$0xff]  ;;  %v577_v15 = vld [vmem:[%s4663_s19 + $0x8] sm:$0xff]  ;;  %v578_v17 = vld [vmem:[%s4663_s19 + $0x10] sm:$0xff] }
  0x12   : > { %v379_v16 = vld [vmem:[%s4658_s16 + $0x8] sm:$0xff]  ;;  %v380_v18 = vld [vmem:[%s4658_s16 + $0x10] sm:$0xff]  ;;  %v579_v19 = vld [vmem:[%s4663_s19 + $0x18] sm:$0xff] }
  0x13   : > { %v381_v20 = vld [vmem:[%s4658_s16 + $0x18] sm:$0xff]  ;;  %v580_v21 = vld [vmem:[%s4663_s19 + $0x20] sm:$0xff]  ;;  %v581_v23 = vld [vmem:[%s4663_s19 + $0x28] sm:$0xff] }
  0x14   : > { %4015 = vmatpush3.bf16.msra.mxu0 %v4014_v13  ;;  %4435 = vmatpush3.bf16.msra.mxu1 %v4014_v13  ;;  %v382_v22 = vld [vmem:[%s4658_s16 + $0x20] sm:$0xff]  ;;  %v383_v24 = vld [vmem:[%s4658_s16 + $0x28] sm:$0xff]  ;;  %v582_v25 = vld [vmem:[%s4663_s19 + $0x30] sm:$0xff] }
  0x15   : > { %4016 = vmatprep.subr.bf16.mxu0 %v4557_v3  ;;  %v384_v26 = vld [vmem:[%s4658_s16 + $0x30] sm:$0xff]  ;;  %v583_v27 = vld [vmem:[%s4663_s19 + $0x38] sm:$0xff]  ;;  %v584_v29 = vld [vmem:[%s4663_s19 + $0x40] sm:$0xff] }
  0x16   : > { %v385_v28 = vld [vmem:[%s4658_s16 + $0x38] sm:$0xff]  ;;  %v386_v30 = vld [vmem:[%s4658_s16 + $0x40] sm:$0xff] }
  0x17   : > { %3739 = vmatmul.mubr.msk.f32.vlgmr.msra.gmra.mrb[0].mxu0 %vm402_vm1, %v378_v14  ;;  %3785 = vmatmul.mubr.msk.f32.vlgmr.msra.gmra.mrb[0].mxu1 %vm402_vm1, %v577_v15  ;;  %v576_v31 = vld [vmem:[%s4663_s19] sm:$0xff] }
  0x18   : > { %4018 = vmatpush3.bf16.msra.mxu0 %v4005_v4  ;;  %3741 = vmatprep.mubr.msk.f32.mxu0 %vm4558_vm0, %v4559_v6 }
  0x19   : > { %4019 = vmatprep.subr.bf16.mxu0 %v4557_v3  ;;  %3787 = vmatprep.mubr.msk.f32.mxu1 %vm4558_vm0, %v4559_v6 }
  0x1b   : > { %3742 = vmatmul.mubr.msk.f32.gmra.mrb[2].mxu0 %vm402_vm1, %v379_v16  ;;  %3788 = vmatmul.mubr.msk.f32.gmra.mrb[2].mxu1 %vm402_vm1, %v578_v17 }
  0x1c   : > { %3744 = vmatprep.mubr.msk.f32.mxu0 %vm4558_vm0, %v4559_v6  ;;  %4021 = vmatpush3.bf16.msra.mxu0 %v4008_v7 }
  0x1d   : > { %4022 = vmatprep.subr.bf16.mxu0 %v4557_v3  ;;  %3790 = vmatprep.mubr.msk.f32.mxu1 %vm4558_vm0, %v4559_v6 }
  0x1f   : > { %3745 = vmatmul.mubr.msk.f32.gmra.mrb[4].mxu0 %vm402_vm1, %v380_v18  ;;  %3791 = vmatmul.mubr.msk.f32.gmra.mrb[4].mxu1 %vm402_vm1, %v579_v19 }
  0x20   : > { %3747 = vmatprep.mubr.msk.f32.mxu0 %vm4558_vm0, %v4559_v6  ;;  %4024 = vmatpush3.bf16.msra.mxu0 %v4011_v10 }
  0x21   : > { %4025 = vmatprep.subr.bf16.mxu0 %v4557_v3  ;;  %3793 = vmatprep.mubr.msk.f32.mxu1 %vm4558_vm0, %v4559_v6 }
  0x23   : > { %3748 = vmatmul.mubr.msk.f32.gmra.mrb[6].mxu0 %vm402_vm1, %v381_v20  ;;  %3794 = vmatmul.mubr.msk.f32.gmra.mrb[6].mxu1 %vm402_vm1, %v580_v21 }
  0x24   : > { %3750 = vmatprep.mubr.msk.f32.mxu0 %vm4558_vm0, %v4559_v6  ;;  %4027 = vmatpush3.bf16.msra.mxu0 %v4014_v13 }
  0x25   : > { %3796 = vmatprep.mubr.msk.f32.mxu1 %vm4558_vm0, %v4559_v6  ;;  %4029 = vmatprep.subr.bf16.mxu0 %v4028_v34 }
  0x27   : > { %3751 = vmatmul.mubr.msk.f32.gmra.mrb[8].mxu0 %vm402_vm1, %v382_v22  ;;  %3797 = vmatmul.mubr.msk.f32.gmra.mrb[8].mxu1 %vm402_vm1, %v581_v23 }
  0x28   : > { %3753 = vmatprep.mubr.msk.f32.mxu0 %vm4558_vm0, %v4559_v6  ;;  %3799 = vmatprep.mubr.msk.f32.mxu1 %vm4558_vm0, %v4559_v6 }
  0x2b   : > { %3754 = vmatmul.mubr.msk.f32.gmra.mrb[10].mxu0 %vm402_vm1, %v383_v24  ;;  %3800 = vmatmul.mubr.msk.f32.gmra.mrb[10].mxu1 %vm402_vm1, %v582_v25 }
  0x2c   : > { %3756 = vmatprep.mubr.msk.f32.mxu0 %vm4558_vm0, %v4559_v6  ;;  %3802 = vmatprep.mubr.msk.f32.mxu1 %vm4558_vm0, %v4559_v6 }
  0x2f   : > { %3757 = vmatmul.mubr.msk.f32.gmra.mrb[12].mxu0 %vm402_vm1, %v384_v26  ;;  %3803 = vmatmul.mubr.msk.f32.gmra.mrb[12].mxu1 %vm402_vm1, %v583_v27 }
  0x30   : > { %3759 = vmatprep.mubr.msk.f32.mxu0 %vm4558_vm0, %v4559_v6  ;;  %3805 = vmatprep.mubr.msk.f32.mxu1 %vm4558_vm0, %v4559_v6 }
  0x33   : > { %3760 = vmatmul.mubr.msk.f32.gmra.mrb[14].mxu0 %vm402_vm1, %v385_v28  ;;  %3806 = vmatmul.mubr.msk.f32.gmra.mrb[14].mxu1 %vm402_vm1, %v584_v29 }
  0x34   : > { %3762 = vmatprep.mubr.msk.f32.mxu0 %vm4558_vm0, %v4559_v6  ;;  %2024 = vmatprep.mubr.f32.mxu1 %v4559_v6 }
  0x37   : > { %3763 = vmatmul.mubr.msk.f32.gmra.mrb[16].mxu0 %vm402_vm1, %v386_v30 }
  0x38   : > { %3781 = vmatprep.mubr.msk.f32.mxu0 %vm4558_vm0, %v4559_v6 }
  0x3b   : > { %3782 = vmatmul.mubr.msk.f32.vlgmr.msra.gmra.mrb[18].mxu0 %vm402_vm1, %v576_v31 }
  0x3c   : > { %4031 = vmatpush3.bf16.msra.mxu0 %v4028_v34 }
  0x3d   : > { %4033 = vmatprep.subr.bf16.mxu0 %v4032_v37 }
  0x40   : > { %4035 = vmatpush3.bf16.msra.mxu0 %v4032_v37 }
  0x41   : > { %4037 = vmatprep.subr.bf16.mxu0 %v4036_v40 }
  0x44   : > { %4039 = vmatpush3.bf16.msra.mxu0 %v4036_v40 }
  0x45   : > { %4041 = vmatprep.subr.bf16.mxu0 %v4040_v43 }
  0x48   : > { %4043 = vmatpush3.bf16.msra.mxu0 %v4040_v43 }
  0x49   : > { %4045 = vmatprep.subr.bf16.mxu0 %v4764_v46 }
  0xea   : > { %v496_v48 = vpop.f32.mrb[0].mxu0  ;;  %v698_v49 = vpop.f32.mrb[0].mxu1 }
  0xeb   : > { %v497_v50 = vadd.f32 %v4770_v47, %v496_v48  ;;  %v3740_v51 = vpop.f32.mrb[1].mxu0  ;;  %v699_v52 = vadd.f32 %v4770_v47, %v698_v49  ;;  %v3786_v53 = vpop.f32.mrb[1].mxu1 }
  0xed   : > { %vm540_vm2 = vcmp.gt.f32.partialorder %v497_v50, 0.0  ;;  %v549_v54 = vmul.f32 0.01, %v497_v50  ;;  %vm738_vm3 = vcmp.gt.f32.partialorder %v699_v52, 0.0  ;;  %v747_v55 = vmul.f32 0.01, %v699_v52 }
  0xee   : > { %v501_v56 = vpop.f32.mrb[2].mxu0  ;;  %v703_v57 = vpop.f32.mrb[2].mxu1 }
  0xef   : > { %v558_v58 = vsel %vm540_vm2, %v497_v50, %v549_v54  ;;  %v502_v59 = vadd.f32 %v4770_v47, %v501_v56  ;;  %v3743_v60 = vpop.f32.mrb[3].mxu0  ;;  %v756_v61 = vsel %vm738_vm3, %v699_v52, %v747_v55  ;;  %v704_v62 = vadd.f32 %v4770_v47, %v703_v57  ;;  %v3789_v63 = vpop.f32.mrb[3].mxu1 }
  0xf0   : > { %567 = vst.msk [vmem:[#allocation2] sm:$0xff] %vm402_vm1, %v558_v58  ;;  %765 = vst.msk [vmem:[#allocation3 + $0x8] sm:$0xff] %vm402_vm1, %v756_v61 }
  0xf1   : > { %vm541_vm4 = vcmp.gt.f32.partialorder %v502_v59, 0.0  ;;  %v550_v0 = vmul.f32 0.01, %v502_v59  ;;  %vm739_vm5 = vcmp.gt.f32.partialorder %v704_v62, 0.0  ;;  %v748_v1 = vmul.f32 0.01, %v704_v62 }
  0xf2   : > { %v506_v2 = vpop.f32.mrb[4].mxu0  ;;  %v708_v3 = vpop.f32.mrb[4].mxu1 }
  0xf3   : > { %v559_v4 = vsel %vm541_vm4, %v502_v59, %v550_v0  ;;  %v507_v5 = vadd.f32 %v4770_v47, %v506_v2  ;;  %v3746_v7 = vpop.f32.mrb[5].mxu0  ;;  %v757_v8 = vsel %vm739_vm5, %v704_v62, %v748_v1  ;;  %v709_v9 = vadd.f32 %v4770_v47, %v708_v3  ;;  %v3792_v10 = vpop.f32.mrb[5].mxu1  ;;  %v3383_v2 = vld [vmem:[%s6215_s6 + $0x108] sm:$0xff]  ;;  %v3385_v3 = vld [vmem:[%s6215_s6 + $0x118] sm:$0xff] }
  0xf4   : > { %568 = vst.msk [vmem:[#allocation2 + $0x8] sm:$0xff] %vm402_vm1, %v559_v4  ;;  %766 = vst.msk [vmem:[#allocation3 + $0x10] sm:$0xff] %vm402_vm1, %v757_v8 }
  0xf5   : > { %vm542_vm6 = vcmp.gt.f32.partialorder %v507_v5, 0.0  ;;  %v551_v11 = vmul.f32 0.01, %v507_v5  ;;  %vm740_vm7 = vcmp.gt.f32.partialorder %v709_v9, 0.0  ;;  %v749_v12 = vmul.f32 0.01, %v709_v9 }
  0xf6   : > { %v511_v13 = vpop.f32.mrb[6].mxu0  ;;  %v713_v14 = vpop.f32.mrb[6].mxu1 }
  0xf7   : > { %v560_v15 = vsel %vm542_vm6, %v507_v5, %v551_v11  ;;  %v512_v16 = vadd.f32 %v4770_v47, %v511_v13  ;;  %v3749_v17 = vpop.f32.mrb[7].mxu0  ;;  %v758_v18 = vsel %vm740_vm7, %v709_v9, %v749_v12  ;;  %v714_v19 = vadd.f32 %v4770_v47, %v713_v14  ;;  %v3795_v20 = vpop.f32.mrb[7].mxu1  ;;  %v3382_v11 = vld [vmem:[%s6215_s6 + $0x100] sm:$0xff]  ;;  %v3384_v12 = vld [vmem:[%s6215_s6 + $0x110] sm:$0xff] }
  0xf8   : > { %569 = vst.msk [vmem:[#allocation2 + $0x10] sm:$0xff] %vm402_vm1, %v560_v15  ;;  %767 = vst.msk [vmem:[#allocation3 + $0x18] sm:$0xff] %vm402_vm1, %v758_v18  ;;  %v4140_v9 = vpack.c.bf16 %v3385_v3, %v3383_v2  ;;  %v4142_v14 = vpack.c.bf16 %v3384_v12, %v3382_v11  ;;  %v3387_v15 = vld [vmem:[%s6215_s6 + $0x128] sm:$0xff]  ;;  %v773_v2 = vld [vmem:[#allocation2] sm:$0xff] }
  0xf9   : > { %vm543_vm8 = vcmp.gt.f32.partialorder %v512_v16, 0.0  ;;  %v552_v21 = vmul.f32 0.01, %v512_v16  ;;  %vm741_vm9 = vcmp.gt.f32.partialorder %v714_v19, 0.0  ;;  %v750_v22 = vmul.f32 0.01, %v714_v19 }
  0xfa   : > { %v516_v23 = vpop.f32.mrb[8].mxu0  ;;  %v718_v24 = vpop.f32.mrb[8].mxu1  ;;  %4141 = vmatprep.subr.bf16.mxu1 %v4140_v9  ;;  %v3307_v11 = vld [vmem:[%s6213_s4 + $0xb0] sm:$0xff]  ;;  %v3308_v12 = vld [vmem:[%s6213_s4 + $0xb8] sm:$0xff] }
  0xfb   : > { %v561_v25 = vsel %vm543_vm8, %v512_v16, %v552_v21  ;;  %v517_v26 = vadd.f32 %v4770_v47, %v516_v23  ;;  %v3752_v27 = vpop.f32.mrb[9].mxu0  ;;  %v759_v28 = vsel %vm741_vm9, %v714_v19, %v750_v22  ;;  %v719_v29 = vadd.f32 %v4770_v47, %v718_v24  ;;  %v3798_v30 = vpop.f32.mrb[9].mxu1  ;;  %v3389_v16 = vld [vmem:[%s6215_s6 + $0x138] sm:$0xff]  ;;  %v3386_v21 = vld [vmem:[%s6215_s6 + $0x120] sm:$0xff]  ;;  %4143 = vmatpush1.bf16.msra.mxu1 %v4142_v14  ;;  %v3388_v23 = vld [vmem:[%s6215_s6 + $0x130] sm:$0xff] }
  0xfc   : > { %570 = vst.msk [vmem:[#allocation2 + $0x18] sm:$0xff] %vm402_vm1, %v561_v25  ;;  %768 = vst.msk [vmem:[#allocation3 + $0x20] sm:$0xff] %vm402_vm1, %v759_v28  ;;  %v4144_v20 = vpack.c.bf16 %v3389_v16, %v3387_v15  ;;  %v4146_v24 = vpack.c.bf16 %v3388_v23, %v3386_v21  ;;  %v3393_v25 = vld [vmem:[%s6215_s6 + $0x158] sm:$0xff]  ;;  %v3392_v27 = vld [vmem:[%s6215_s6 + $0x150] sm:$0xff]  ;;  %v4072_v14 = vpack.c.bf16 %v3308_v12, %v3307_v11 }
  0xfd   : > { %vm544_vm10 = vcmp.gt.f32.partialorder %v517_v26, 0.0  ;;  %v553_v31 = vmul.f32 0.01, %v517_v26  ;;  %vm742_vm11 = vcmp.gt.f32.partialorder %v719_v29, 0.0  ;;  %v751_v32 = vmul.f32 0.01, %v719_v29 }
  0xfe   : > { %v521_v33 = vpop.f32.mrb[10].mxu0  ;;  %v723_v34 = vpop.f32.mrb[10].mxu1  ;;  %4145 = vmatprep.subr.bf16.mxu1 %v4144_v20  ;;  %v3317_v16 = vld [vmem:[%s6213_s4 + $0xc0] sm:$0xff]  ;;  %v3319_v21 = vld [vmem:[%s6213_s4 + $0xd0] sm:$0xff] }
  0xff   : > { %v562_v35 = vsel %vm544_vm10, %v517_v26, %v553_v31  ;;  %v522_v36 = vadd.f32 %v4770_v47, %v521_v33  ;;  %v3755_v37 = vpop.f32.mrb[11].mxu0  ;;  %v760_v38 = vsel %vm742_vm11, %v719_v29, %v751_v32  ;;  %v724_v39 = vadd.f32 %v4770_v47, %v723_v34  ;;  %v3801_v40 = vpop.f32.mrb[11].mxu1  ;;  %v3390_v26 = vld [vmem:[%s6215_s6 + $0x140] sm:$0xff]  ;;  %4147 = vmatpush1.bf16.msra.mxu1 %v4146_v24  ;;  %v3395_v31 = vld [vmem:[%s6215_s6 + $0x168] sm:$0xff]  ;;  %v3397_v32 = vld [vmem:[%s6215_s6 + $0x178] sm:$0xff] }
 0x100   : > { %571 = vst.msk [vmem:[#allocation2 + $0x20] sm:$0xff] %vm402_vm1, %v562_v35  ;;  %769 = vst.msk [vmem:[#allocation3 + $0x28] sm:$0xff] %vm402_vm1, %v760_v38  ;;  %v4150_v30 = vpack.c.bf16 %v3392_v27, %v3390_v26  ;;  %v3394_v33 = vld [vmem:[%s6215_s6 + $0x160] sm:$0xff]  ;;  %v4152_v34 = vpack.c.bf16 %v3397_v32, %v3395_v31  ;;  %v3396_v35 = vld [vmem:[%s6215_s6 + $0x170] sm:$0xff] }
 0x101   : > { %vm545_vm12 = vcmp.gt.f32.partialorder %v522_v36, 0.0  ;;  %v554_v41 = vmul.f32 0.01, %v522_v36  ;;  %vm743_vm13 = vcmp.gt.f32.partialorder %v724_v39, 0.0  ;;  %v752_v42 = vmul.f32 0.01, %v724_v39 }
 0x102   : > { %v526_v43 = vpop.f32.mrb[12].mxu0  ;;  %v728_v44 = vpop.f32.mrb[12].mxu1  ;;  %v3401_v37 = vld [vmem:[%s6215_s6 + $0x198] sm:$0xff]  ;;  %v783_v38 = vld [vmem:[%s6213_s4 + $0x10] sm:$0xff]  ;;  %v4154_v40 = vpack.c.bf16 %v3396_v35, %v3394_v33  ;;  %v1064_v23 = vld [vmem:[#allocation2 + $0x1] sm:$0xff] }
 0x103   : > { %v563_v45 = vsel %vm545_vm12, %v522_v36, %v554_v41  ;;  %v527_v48 = vadd.f32 %v4770_v47, %v526_v43  ;;  %v3758_v49 = vpop.f32.mrb[13].mxu0  ;;  %v761_v50 = vsel %vm743_vm13, %v724_v39, %v752_v42  ;;  %v729_v51 = vadd.f32 %v4770_v47, %v728_v44  ;;  %v3804_v52 = vpop.f32.mrb[13].mxu1  ;;  %v3399_v36 = vld [vmem:[%s6215_s6 + $0x188] sm:$0xff]  ;;  %v784_v39 = vld [vmem:[%s6213_s4 + $0x18] sm:$0xff]  ;;  %v3398_v42 = vld [vmem:[%s6215_s6 + $0x180] sm:$0xff] }
 0x104   : > { %572 = vst.msk [vmem:[#allocation2 + $0x28] sm:$0xff] %vm402_vm1, %v563_v45  ;;  %770 = vst.msk [vmem:[#allocation3 + $0x30] sm:$0xff] %vm402_vm1, %v761_v50  ;;  %v4156_v41 = vpack.c.bf16 %v3401_v37, %v3399_v36  ;;  %v3400_v43 = vld [vmem:[%s6215_s6 + $0x190] sm:$0xff]  ;;  %v4048_v45 = vpack.c.bf16 %v784_v39, %v783_v38  ;;  %v785_v49 = vld [vmem:[%s6213_s4 + $0x20] sm:$0xff] }
 0x105   : > { %vm546_vm14 = vcmp.gt.f32.partialorder %v527_v48, 0.0  ;;  %v555_v53 = vmul.f32 0.01, %v527_v48  ;;  %vm744_vm15 = vcmp.gt.f32.partialorder %v729_v51, 0.0  ;;  %v753_v54 = vmul.f32 0.01, %v729_v51 }
 0x106   : > { %v531_v55 = vpop.f32.mrb[14].mxu0  ;;  %v733_v56 = vpop.f32.mrb[14].mxu1  ;;  %v786_v50 = vld [vmem:[%s6213_s4 + $0x28] sm:$0xff]  ;;  %v791_v52 = vld [vmem:[#allocation3 + $0x10] sm:$0xff]  ;;  %v3333_v35 = vld [vmem:[%s6213_s4 + $0x100] sm:$0xff] }
 0x107   : > { %v564_v57 = vsel %vm546_vm14, %v527_v48, %v555_v53  ;;  %v532_v58 = vadd.f32 %v4770_v47, %v531_v55  ;;  %v3761_v59 = vpop.f32.mrb[15].mxu0  ;;  %v762_v60 = vsel %vm744_vm15, %v729_v51, %v753_v54  ;;  %v734_v61 = vadd.f32 %v4770_v47, %v733_v56  ;;  %v3807_v62 = vpop.f32.mrb[15].mxu1  ;;  %v790_v48 = vld [vmem:[#allocation3 + $0x8] sm:$0xff]  ;;  %v792_v54 = vld [vmem:[#allocation3 + $0x18] sm:$0xff]  ;;  %v788_v56 = vld [vmem:[%s6213_s4 + $0x38] sm:$0xff] }
 0x108   : > { %573 = vst.msk [vmem:[#allocation2 + $0x30] sm:$0xff] %vm402_vm1, %v564_v57  ;;  %771 = vst.msk [vmem:[#allocation3 + $0x38] sm:$0xff] %vm402_vm1, %v762_v60  ;;  %v4158_v51 = vpack.c.bf16 %v3400_v43, %v3398_v42  ;;  %v4052_v53 = vpack.c.bf16 %v786_v50, %v785_v49  ;;  %v787_v55 = vld [vmem:[%s6213_s4 + $0x30] sm:$0xff]  ;;  %v793_v57 = vld [vmem:[#allocation3 + $0x20] sm:$0xff]  ;;  %vm2586_vm14 = vcmask 1046528  }
 0x109   : > { %vm547_vm0 = vcmp.gt.f32.partialorder %v532_v58, 0.0  ;;  %v556_v63 = vmul.f32 0.01, %v532_v58  ;;  %vm745_vm2 = vcmp.gt.f32.partialorder %v734_v61, 0.0  ;;  %v754_v0 = vmul.f32 0.01, %v734_v61 }
 0x10a   : > { %v536_v1 = vpop.f32.mrb[16].mxu0  ;;  %v3301_v59 = vld [vmem:[%s6213_s4 + $0x80] sm:$0xff]  ;;  %v3302_v60 = vld [vmem:[%s6213_s4 + $0x88] sm:$0xff]  ;;  %v1066_v27 = vld [vmem:[#allocation2 + $0x11] sm:$0xff] }
 0x10b   : > { %v565_v4 = vsel %vm547_vm0, %v532_v58, %v556_v63  ;;  %v537_v5 = vadd.f32 %v4770_v47, %v536_v1  ;;  %v3764_v7 = vpop.f32.mrb[17].mxu0  ;;  %v763_v8 = vsel %vm745_vm2, %v734_v61, %v754_v0  ;;  %v794_v58 = vld [vmem:[#allocation3 + $0x28] sm:$0xff]  ;;  %v795_v61 = vld [vmem:[#allocation3 + $0x30] sm:$0xff]  ;;  %v4060_v62 = vpack.c.bf16 %v3302_v60, %v3301_v59  ;;  %v778_v15 = vld [vmem:[#allocation2 + $0x28] sm:$0xff] }
 0x10c   : > { %574 = vst.msk [vmem:[#allocation2 + $0x38] sm:$0xff] %vm402_vm1, %v565_v4  ;;  %772 = vst.msk [vmem:[#allocation3 + $0x40] sm:$0xff] %vm402_vm1, %v763_v8  ;;  %v3303_v0 = vld [vmem:[%s6213_s4 + $0x90] sm:$0xff]  ;;  %v3304_v1 = vld [vmem:[%s6213_s4 + $0x98] sm:$0xff]  ;;  %vm2900_vm2 = vcmask 1045504  }
 0x10d   : > { %vm548_vm3 = vcmp.gt.f32.partialorder %v537_v5, 0.0  ;;  %v557_v10 = vmul.f32 0.01, %v537_v5  ;;  %v4064_v3 = vpack.c.bf16 %v3304_v1, %v3303_v0  ;;  %v774_v4 = vld [vmem:[#allocation2 + $0x8] sm:$0xff]  ;;  %v775_v8 = vld [vmem:[#allocation2 + $0x10] sm:$0xff]  ;;  %v3324_v31 = vld [vmem:[%s6213_s4 + $0xf8] sm:$0xff] }
 0x10e   : > { %v693_v13 = vpop.f32.mrb[18].mxu0  ;;  %v3306_v7 = vld [vmem:[%s6213_s4 + $0xa8] sm:$0xff]  ;;  %v1220_v49 = vld [vmem:[#allocation3 + $0x11] sm:$0xff] }
 0x10f   : > { %v566_v17 = vsel %vm548_vm3, %v537_v5, %v557_v10  ;;  %v694_v18 = vadd.f32 %v4770_v47, %v693_v13  ;;  %v3783_v19 = vpop.f32.mrb[19].mxu0  ;;  %v3391_v47 = vld [vmem:[%s6215_s6 + $0x148] sm:$0xff]  ;;  %v796_v63 = vld [vmem:[#allocation3 + $0x38] sm:$0xff]  ;;  %v776_v10 = vld [vmem:[#allocation2 + $0x18] sm:$0xff] }
 0x110   : > { %575 = vst.msk [vmem:[#allocation2 + $0x40] sm:$0xff] %vm402_vm1, %v566_v17  ;;  %v4148_v29 = vpack.c.bf16 %v3393_v25, %v3391_v47  ;;  %v3305_v5 = vld [vmem:[%s6213_s4 + $0xa0] sm:$0xff]  ;;  %v3318_v17 = vld [vmem:[%s6213_s4 + $0xc8] sm:$0xff] }
 0x111   : > { %vm737_vm4 = vcmp.gt.f32.partialorder %v694_v18, 0.0  ;;  %v746_v22 = vmul.f32 0.01, %v694_v18  ;;  %v4068_v9 = vpack.c.bf16 %v3306_v7, %v3305_v5  ;;  %v777_v13 = vld [vmem:[#allocation2 + $0x20] sm:$0xff]  ;;  %v4076_v19 = vpack.c.bf16 %v3318_v17, %v3317_v16  ;;  %v1065_v24 = vld [vmem:[#allocation2 + $0x9] sm:$0xff] }
 0x112   : > { %4149 = vmatprep.subr.bf16.mxu1 %v4148_v29  ;;  %v3321_v25 = vld [vmem:[%s6213_s4 + $0xe0] sm:$0xff]  ;;  %v3322_v26 = vld [vmem:[%s6213_s4 + $0xe8] sm:$0xff] }
 0x113   : > { %v755_v28 = vsel %vm737_vm4, %v694_v18, %v746_v22  ;;  %4151 = vmatpush1.bf16.msra.mxu1 %v4150_v30  ;;  %v779_v18 = vld [vmem:[#allocation2 + $0x30] sm:$0xff]  ;;  %v780_v20 = vld [vmem:[#allocation2 + $0x38] sm:$0xff]  ;;  %v1068_v32 = vld [vmem:[#allocation2 + $0x21] sm:$0xff] }
 0x114   : > { %764 = vst.msk [vmem:[#allocation3] sm:$0xff] %vm402_vm1, %v755_v28  ;;  %4153 = vmatprep.subr.bf16.mxu1 %v4152_v34  ;;  %v3320_v22 = vld [vmem:[%s6213_s4 + $0xd8] sm:$0xff]  ;;  %v4084_v28 = vpack.c.bf16 %v3322_v26, %v3321_v25  ;;  %v3323_v30 = vld [vmem:[%s6213_s4 + $0xf0] sm:$0xff]  ;;  %v3334_v36 = vld [vmem:[%s6213_s4 + $0x108] sm:$0xff] }
 0x115   : > { %v4080_v47 = vpack.c.bf16 %v3320_v22, %v3319_v21  ;;  %v1067_v29 = vld [vmem:[#allocation2 + $0x19] sm:$0xff]  ;;  %v4088_v33 = vpack.c.bf16 %v3324_v31, %v3323_v30  ;;  %v1069_v34 = vld [vmem:[#allocation2 + $0x29] sm:$0xff]  ;;  %v1070_v37 = vld [vmem:[#allocation2 + $0x31] sm:$0xff]  ;;  %v4092_v38 = vpack.c.bf16 %v3334_v36, %v3333_v35 }
 0x116   : > { %v1225_v60 = vld [vmem:[#allocation3 + $0x39] sm:$0xff]  ;;  %v1373_v1 = vld [vmem:[#allocation2 + $0xa] sm:$0xff]  ;;  %v1527_v22 = vld [vmem:[#allocation3 + $0xa] sm:$0xff] }
 0x117   : > { %4155 = vmatpush1.bf16.msra.mxu1 %v4154_v40  ;;  %v1071_v39 = vld [vmem:[#allocation2 + $0x39] sm:$0xff]  ;;  %v3335_v40 = vld [vmem:[%s6213_s4 + $0x110] sm:$0xff]  ;;  %v1529_v26 = vld [vmem:[#allocation3 + $0x1a] sm:$0xff] }
 0x118   : > { %4157 = vmatprep.subr.bf16.mxu1 %v4156_v41  ;;  %v3336_v41 = vld [vmem:[%s6213_s4 + $0x118] sm:$0xff]  ;;  %v1377_v12 = vld [vmem:[#allocation2 + $0x2a] sm:$0xff] }
 0x119   : > { %v4096_v43 = vpack.c.bf16 %v3336_v41, %v3335_v40  ;;  %v1375_v7 = vld [vmem:[#allocation2 + $0x1a] sm:$0xff]  ;;  %v1531_v31 = vld [vmem:[#allocation3 + $0x2a] sm:$0xff] }
 0x11a   : > { %v1379_v17 = vld [vmem:[#allocation2 + $0x3a] sm:$0xff]  ;;  %v1681_v35 = vld [vmem:[#allocation2 + $0xb] sm:$0xff] }
 0x11b   : > { %v789_v44 = vld [vmem:[#allocation3] sm:$0xff]  ;;  %4159 = vmatpush1.bf16.msra.mxu1 %v4158_v51  ;;  %v1682_v36 = vld [vmem:[#allocation2 + $0x13] sm:$0xff]  ;;  %v1687_v41 = vld [vmem:[#allocation2 + $0x3b] sm:$0xff] }
 0x11c   : > { %3824 = vmatprep.mubr.msk.f32.mxu0 %vm402_vm1, %v789_v44  ;;  %v1218_v42 = vld [vmem:[#allocation3 + $0x1] sm:$0xff]  ;;  %v1219_v44 = vld [vmem:[#allocation3 + $0x9] sm:$0xff]  ;;  %v1221_v51 = vld [vmem:[#allocation3 + $0x19] sm:$0xff] }
 0x11d   : > { %3825 = vmatmul.mubr.msk.f32.vlgmr.msra.gmra.mrb[20].mxu0 %vm402_vm1, %v790_v48  ;;  %v3338_v48 = vld [vmem:[%s6213_s4 + $0x128] sm:$0xff]  ;;  %v1686_v40 = vld [vmem:[#allocation2 + $0x33] sm:$0xff] }
 0x11e   : > { %3827 = vmatprep.mubr.msk.f32.mxu0 %vm402_vm1, %v791_v52  ;;  %4047 = vmatpush3.bf16.msra.mxu0 %v4764_v46  ;;  %v4056_v46 = vpack.c.bf16 %v788_v56, %v787_v55  ;;  %v3339_v52 = vld [vmem:[%s6213_s4 + $0x130] sm:$0xff] }
 0x11f   : > { %4049 = vmatprep.subr.bf16.mxu0 %v4048_v45  ;;  %v1223_v56 = vld [vmem:[#allocation3 + $0x29] sm:$0xff] }
 0x121   : > { %3828 = vmatmul.mubr.msk.f32.gmra.mrb[22].mxu0 %vm402_vm1, %v792_v54  ;;  %v1222_v54 = vld [vmem:[#allocation3 + $0x21] sm:$0xff] }
 0x122   : > { %3830 = vmatprep.mubr.msk.f32.mxu0 %vm402_vm1, %v793_v57  ;;  %4051 = vmatpush3.bf16.msra.mxu0 %v4048_v45  ;;  %v3337_v45 = vld [vmem:[%s6213_s4 + $0x120] sm:$0xff] }
 0x123   : > { %4053 = vmatprep.subr.bf16.mxu0 %v4052_v53  ;;  %v4100_v50 = vpack.c.bf16 %v3338_v48, %v3337_v45  ;;  %v3349_v57 = vld [vmem:[%s6213_s4 + $0x140] sm:$0xff]  ;;  %v3404_v48 = vld [vmem:[%s6215_s6 + $0x1b0] sm:$0xff] }
 0x124   : > { %v3402_v45 = vld [vmem:[%s6215_s6 + $0x1a0] sm:$0xff] }
 0x125   : > { %3831 = vmatmul.mubr.msk.f32.gmra.mrb[24].mxu0 %vm402_vm1, %v794_v58  ;;  %v1224_v58 = vld [vmem:[#allocation3 + $0x31] sm:$0xff] }
 0x126   : > { %3833 = vmatprep.mubr.msk.f32.mxu0 %vm402_vm1, %v795_v61  ;;  %4055 = vmatpush3.bf16.msra.mxu0 %v4052_v53  ;;  %v3340_v53 = vld [vmem:[%s6213_s4 + $0x138] sm:$0xff]  ;;  %v3351_v61 = vld [vmem:[%s6213_s4 + $0x150] sm:$0xff] }
 0x127   : > { %4057 = vmatprep.subr.bf16.mxu0 %v4056_v46  ;;  %v4104_v55 = vpack.c.bf16 %v3340_v53, %v3339_v52  ;;  %v3406_v53 = vld [vmem:[%s6215_s6 + $0x1c0] sm:$0xff] }
 0x129   : > { %3834 = vmatmul.mubr.msk.f32.gmra.mrb[26].mxu0 %vm402_vm1, %v796_v63  ;;  %v1372_v63 = vld [vmem:[#allocation2 + $0x2] sm:$0xff] }
 0x12a   : > { %4059 = vmatpush3.bf16.msra.mxu0 %v4056_v46  ;;  %3852 = vmatprep.mubr.msk.f32.mxu0 %vm402_vm1, %v773_v2  ;;  %v3350_v46 = vld [vmem:[%s6213_s4 + $0x148] sm:$0xff]  ;;  %v3353_v2 = vld [vmem:[%s6213_s4 + $0x160] sm:$0xff] }
 0x12b   : > { %4061 = vmatprep.subr.bf16.mxu0 %v4060_v62  ;;  %v4108_v59 = vpack.c.bf16 %v3350_v46, %v3349_v57  ;;  %v3413_v57 = vld [vmem:[%s6215_s6 + $0x1f8] sm:$0xff] }
 0x12d   : > { %3853 = vmatmul.mubr.msk.f32.vlgmr.msra.gmra.mrb[20].mxu0 %vm402_vm1, %v774_v4  ;;  %v1374_v4 = vld [vmem:[#allocation2 + $0x12] sm:$0xff] }
 0x12e   : > { %3855 = vmatprep.mubr.msk.f32.mxu0 %vm402_vm1, %v775_v8  ;;  %4063 = vmatpush3.bf16.msra.mxu0 %v4060_v62  ;;  %v3352_v62 = vld [vmem:[%s6213_s4 + $0x158] sm:$0xff]  ;;  %v3355_v8 = vld [vmem:[%s6213_s4 + $0x170] sm:$0xff] }
 0x12f   : > { %4065 = vmatprep.subr.bf16.mxu0 %v4064_v3  ;;  %v4112_v0 = vpack.c.bf16 %v3352_v62, %v3351_v61  ;;  %v1889_v61 = vld [vmem:[%s6215_s6 + $0x8] sm:$0xff]  ;;  %v1891_v62 = vld [vmem:[%s6215_s6 + $0x18] sm:$0xff] }
 0x131   : > { %3856 = vmatmul.mubr.msk.f32.gmra.mrb[22].mxu0 %vm402_vm1, %v776_v10  ;;  %v1376_v10 = vld [vmem:[#allocation2 + $0x22] sm:$0xff] }
 0x132   : > { %3858 = vmatprep.mubr.msk.f32.mxu0 %vm402_vm1, %v777_v13  ;;  %4067 = vmatpush3.bf16.msra.mxu0 %v4064_v3  ;;  %v3354_v3 = vld [vmem:[%s6213_s4 + $0x168] sm:$0xff]  ;;  %v3365_v13 = vld [vmem:[%s6213_s4 + $0x180] sm:$0xff] }
 0x133   : > { %4069 = vmatprep.subr.bf16.mxu0 %v4068_v9  ;;  %v4116_v5 = vpack.c.bf16 %v3354_v3, %v3353_v2  ;;  %v3446_v3 = vld [vmem:[%s6217_s8 + $0x200] sm:$0xff] }
 0x135   : > { %3859 = vmatmul.mubr.msk.f32.gmra.mrb[24].mxu0 %vm402_vm1, %v778_v15  ;;  %v1378_v15 = vld [vmem:[#allocation2 + $0x32] sm:$0xff] }
 0x136   : > { %3861 = vmatprep.mubr.msk.f32.mxu0 %vm402_vm1, %v779_v18  ;;  %4071 = vmatpush3.bf16.msra.mxu0 %v4068_v9  ;;  %v3356_v9 = vld [vmem:[%s6213_s4 + $0x178] sm:$0xff]  ;;  %v3367_v18 = vld [vmem:[%s6213_s4 + $0x190] sm:$0xff] }
 0x137   : > { %4073 = vmatprep.subr.bf16.mxu0 %v4072_v14  ;;  %v4120_v11 = vpack.c.bf16 %v3356_v9, %v3355_v8  ;;  %v3453_v8 = vld [vmem:[%s6217_s8 + $0x238] sm:$0xff] }
 0x139   : > { %3862 = vmatmul.mubr.msk.f32.gmra.mrb[26].mxu0 %vm402_vm1, %v780_v20  ;;  %v1526_v20 = vld [vmem:[#allocation3 + $0x2] sm:$0xff] }
 0x13a   : > { %4075 = vmatpush3.bf16.msra.mxu0 %v4072_v14  ;;  %3880 = vmatprep.mubr.msk.f32.mxu0 %vm402_vm1, %v1064_v23  ;;  %v3366_v14 = vld [vmem:[%s6213_s4 + $0x188] sm:$0xff]  ;;  %v3369_v23 = vld [vmem:[%s6213_s4 + $0x1a0] sm:$0xff] }
 0x13b   : > { %4077 = vmatprep.subr.bf16.mxu0 %v4076_v19  ;;  %v4124_v16 = vpack.c.bf16 %v3366_v14, %v3365_v13  ;;  %v3455_v13 = vld [vmem:[%s6217_s8 + $0x248] sm:$0xff]  ;;  %v3457_v14 = vld [vmem:[%s6217_s8 + $0x258] sm:$0xff] }
 0x13d   : > { %3881 = vmatmul.mubr.msk.f32.vlgmr.msra.gmra.mrb[20].mxu0 %vm402_vm1, %v1065_v24  ;;  %v1528_v24 = vld [vmem:[#allocation3 + $0x12] sm:$0xff] }
 0x13e   : > { %3883 = vmatprep.mubr.msk.f32.mxu0 %vm402_vm1, %v1066_v27  ;;  %4079 = vmatpush3.bf16.msra.mxu0 %v4076_v19  ;;  %v3368_v19 = vld [vmem:[%s6213_s4 + $0x198] sm:$0xff]  ;;  %v3371_v27 = vld [vmem:[%s6213_s4 + $0x1b0] sm:$0xff] }
 0x13f   : > { %4081 = vmatprep.subr.bf16.mxu0 %v4080_v47  ;;  %v4128_v21 = vpack.c.bf16 %v3368_v19, %v3367_v18  ;;  %v3459_v18 = vld [vmem:[%s6217_s8 + $0x268] sm:$0xff] }
 0x141   : > { %3884 = vmatmul.mubr.msk.f32.gmra.mrb[22].mxu0 %vm402_vm1, %v1067_v29  ;;  %v1530_v29 = vld [vmem:[#allocation3 + $0x22] sm:$0xff] }
 0x142   : > { %3886 = vmatprep.mubr.msk.f32.mxu0 %vm402_vm1, %v1068_v32  ;;  %4083 = vmatpush3.bf16.msra.mxu0 %v4080_v47  ;;  %v3370_v47 = vld [vmem:[%s6213_s4 + $0x1a8] sm:$0xff]  ;;  %v1532_v32 = vld [vmem:[#allocation3 + $0x32] sm:$0xff] }
 0x143   : > { %4085 = vmatprep.subr.bf16.mxu0 %v4084_v28  ;;  %v4132_v25 = vpack.c.bf16 %v3370_v47, %v3369_v23  ;;  %v3460_v23 = vld [vmem:[%s6217_s8 + $0x270] sm:$0xff]  ;;  %v3463_v47 = vld [vmem:[%s6217_s8 + $0x288] sm:$0xff] }
 0x145   : > { %3887 = vmatmul.mubr.msk.f32.gmra.mrb[24].mxu0 %vm402_vm1, %v1069_v34  ;;  %v1680_v34 = vld [vmem:[#allocation2 + $0x3] sm:$0xff] }
 0x146   : > { %3889 = vmatprep.mubr.msk.f32.mxu0 %vm402_vm1, %v1070_v37  ;;  %4087 = vmatpush3.bf16.msra.mxu0 %v4084_v28  ;;  %v3372_v28 = vld [vmem:[%s6213_s4 + $0x1b8] sm:$0xff] }
 0x147   : > { %4089 = vmatprep.subr.bf16.mxu0 %v4088_v33  ;;  %v4136_v30 = vpack.c.bf16 %v3372_v28, %v3371_v27  ;;  %v1683_v37 = vld [vmem:[#allocation2 + $0x1b] sm:$0xff]  ;;  %v3464_v28 = vld [vmem:[%s6217_s8 + $0x290] sm:$0xff] }
 0x148   : > { %v3462_v27 = vld [vmem:[%s6217_s8 + $0x280] sm:$0xff] }
 0x149   : > { %3890 = vmatmul.mubr.msk.f32.gmra.mrb[26].mxu0 %vm402_vm1, %v1071_v39  ;;  %v1685_v39 = vld [vmem:[#allocation2 + $0x2b] sm:$0xff] }
 0x14a   : > { %4091 = vmatpush3.bf16.msra.mxu0 %v4088_v33  ;;  %3908 = vmatprep.mubr.msk.f32.mxu0 %vm402_vm1, %v1218_v42  ;;  %v1533_v33 = vld [vmem:[#allocation3 + $0x3a] sm:$0xff] }
 0x14b   : > { %4093 = vmatprep.subr.bf16.mxu0 %v4092_v38  ;;  %v3403_v42 = vld [vmem:[%s6215_s6 + $0x1a8] sm:$0xff] }
 0x14d   : > { %3909 = vmatmul.mubr.msk.f32.vlgmr.msra.gmra.mrb[20].mxu0 %vm402_vm1, %v1219_v44 }
 0x14e   : > { %3911 = vmatprep.mubr.msk.f32.mxu0 %vm402_vm1, %v1220_v49  ;;  %4095 = vmatpush3.bf16.msra.mxu0 %v4092_v38  ;;  %v1684_v38 = vld [vmem:[#allocation2 + $0x23] sm:$0xff]  ;;  %v4162_v49 = vpack.c.bf16 %v3404_v48, %v3402_v45 }
 0x14f   : > { %4097 = vmatprep.subr.bf16.mxu0 %v4096_v43 }
 0x151   : > { %3912 = vmatmul.mubr.msk.f32.gmra.mrb[22].mxu0 %vm402_vm1, %v1221_v51  ;;  %v3409_v51 = vld [vmem:[%s6215_s6 + $0x1d8] sm:$0xff] }
 0x152   : > { %3914 = vmatprep.mubr.msk.f32.mxu0 %vm402_vm1, %v1222_v54  ;;  %4099 = vmatpush3.bf16.msra.mxu0 %v4096_v43  ;;  %v3405_v43 = vld [vmem:[%s6215_s6 + $0x1b8] sm:$0xff]  ;;  %v3408_v54 = vld [vmem:[%s6215_s6 + $0x1d0] sm:$0xff] }
 0x153   : > { %4101 = vmatprep.subr.bf16.mxu0 %v4100_v50  ;;  %v4160_v44 = vpack.c.bf16 %v3405_v43, %v3403_v42  ;;  %v3475_v43 = vld [vmem:[%s6217_s8 + $0x2e8] sm:$0xff] }
 0x155   : > { %3915 = vmatmul.mubr.msk.f32.gmra.mrb[24].mxu0 %vm402_vm1, %v1223_v56  ;;  %4161 = vmatprep.subr.bf16.mxu1 %v4160_v44  ;;  %v3411_v56 = vld [vmem:[%s6215_s6 + $0x1e8] sm:$0xff]  ;;  %v3477_v44 = vld [vmem:[%s6217_s8 + $0x2f8] sm:$0xff] }
 0x156   : > { %3917 = vmatprep.mubr.msk.f32.mxu0 %vm402_vm1, %v1224_v58  ;;  %4103 = vmatpush3.bf16.msra.mxu0 %v4100_v50  ;;  %v3407_v50 = vld [vmem:[%s6215_s6 + $0x1c8] sm:$0xff]  ;;  %v4168_v46 = vpack.c.bf16 %v3413_v57, %v3411_v56  ;;  %v3410_v58 = vld [vmem:[%s6215_s6 + $0x1e0] sm:$0xff] }
 0x157   : > { %4105 = vmatprep.subr.bf16.mxu0 %v4104_v55  ;;  %4163 = vmatpush1.bf16.msra.mxu1 %v4162_v49  ;;  %v4164_v52 = vpack.c.bf16 %v3409_v51, %v3407_v50  ;;  %v3479_v57 = vld [vmem:[%s6217_s8 + $0x308] sm:$0xff] }
 0x159   : > { %3918 = vmatmul.mubr.msk.f32.gmra.mrb[26].mxu0 %vm402_vm1, %v1225_v60  ;;  %4165 = vmatprep.subr.bf16.mxu1 %v4164_v52  ;;  %v4264_v52 = vpack.c.bf16 %v3477_v44, %v3475_v43 }
 0x15a   : > { %4107 = vmatpush3.bf16.msra.mxu0 %v4104_v55  ;;  %3936 = vmatprep.mubr.msk.f32.mxu0 %vm402_vm1, %v1372_v63  ;;  %v4166_v55 = vpack.c.bf16 %v3408_v54, %v3406_v53  ;;  %v4172_v63 = vpack.c.bf16 %v1891_v62, %v1889_v61  ;;  %v3474_v53 = vld [vmem:[%s6217_s8 + $0x2e0] sm:$0xff]  ;;  %v3476_v54 = vld [vmem:[%s6217_s8 + $0x2f0] sm:$0xff] }
 0x15b   : > { %4109 = vmatprep.subr.bf16.mxu0 %v4108_v59 }
 0x15c   : > { %4167 = vmatpush1.bf16.msra.mxu1 %v4166_v55 }
 0x15d   : > { %3937 = vmatmul.mubr.msk.f32.vlgmr.msra.gmra.mrb[20].mxu0 %vm402_vm1, %v1373_v1  ;;  %4169 = vmatprep.subr.bf16.mxu1 %v4168_v46  ;;  %v3449_v1 = vld [vmem:[%s6217_s8 + $0x218] sm:$0xff] }
 0x15e   : > { %3939 = vmatprep.mubr.msk.f32.mxu0 %vm402_vm1, %v1374_v4  ;;  %4111 = vmatpush3.bf16.msra.mxu0 %v4108_v59  ;;  %v3412_v59 = vld [vmem:[%s6215_s6 + $0x1f0] sm:$0xff]  ;;  %v3481_v46 = vld [vmem:[%s6217_s8 + $0x318] sm:$0xff] }
 0x15f   : > { %4113 = vmatprep.subr.bf16.mxu0 %v4112_v0  ;;  %v4170_v60 = vpack.c.bf16 %v3412_v59, %v3410_v58  ;;  %v3448_v4 = vld [vmem:[%s6217_s8 + $0x210] sm:$0xff] }
 0x161   : > { %3940 = vmatmul.mubr.msk.f32.gmra.mrb[22].mxu0 %vm402_vm1, %v1375_v7  ;;  %4171 = vmatpush1.bf16.msra.mxu1 %v4170_v60  ;;  %v3451_v7 = vld [vmem:[%s6217_s8 + $0x228] sm:$0xff] }
 0x162   : > { %3942 = vmatprep.mubr.msk.f32.mxu0 %vm402_vm1, %v1376_v10  ;;  %4115 = vmatpush3.bf16.msra.mxu0 %v4112_v0  ;;  %v3447_v0 = vld [vmem:[%s6217_s8 + $0x208] sm:$0xff]  ;;  %v4240_v9 = vpack.c.bf16 %v3453_v8, %v3451_v7  ;;  %v3450_v10 = vld [vmem:[%s6217_s8 + $0x220] sm:$0xff]  ;;  %v3485_v8 = vld [vmem:[%s6217_s8 + $0x338] sm:$0xff] }
 0x163   : > { %4117 = vmatprep.subr.bf16.mxu0 %v4116_v5  ;;  %4173 = vmatprep.subr.bf16.mxu1 %v4172_v63  ;;  %v4236_v2 = vpack.c.bf16 %v3449_v1, %v3447_v0  ;;  %v4266_v63 = vpack.c.bf16 %v3476_v54, %v3474_v53  ;;  %v4268_v1 = vpack.c.bf16 %v3481_v46, %v3479_v57  ;;  %v3483_v7 = vld [vmem:[%s6217_s8 + $0x328] sm:$0xff] }
 0x164   : > { %v1905_v46 = vld [vmem:[%s6215_s6 + $0x88] sm:$0xff] }
 0x165   : > { %3943 = vmatmul.mubr.msk.f32.gmra.mrb[24].mxu0 %vm402_vm1, %v1377_v12 }
 0x166   : > { %3945 = vmatprep.mubr.msk.f32.mxu0 %vm402_vm1, %v1378_v15  ;;  %4119 = vmatpush3.bf16.msra.mxu0 %v4116_v5  ;;  %v4238_v5 = vpack.c.bf16 %v3448_v4, %v3446_v3  ;;  %v4244_v15 = vpack.c.bf16 %v3457_v14, %v3455_v13  ;;  %v3480_v3 = vld [vmem:[%s6217_s8 + $0x310] sm:$0xff] }
 0x167   : > { %4121 = vmatprep.subr.bf16.mxu0 %v4120_v11  ;;  %v1890_v13 = vld [vmem:[%s6215_s6 + $0x10] sm:$0xff] }
 0x169   : > { %3946 = vmatmul.mubr.msk.f32.gmra.mrb[26].mxu0 %vm402_vm1, %v1379_v17  ;;  %v3456_v17 = vld [vmem:[%s6217_s8 + $0x250] sm:$0xff] }
 0x16a   : > { %4123 = vmatpush3.bf16.msra.mxu0 %v4120_v11  ;;  %3964 = vmatprep.mubr.msk.f32.mxu0 %vm402_vm1, %v1526_v20  ;;  %v3452_v11 = vld [vmem:[%s6217_s8 + $0x230] sm:$0xff]  ;;  %v3461_v20 = vld [vmem:[%s6217_s8 + $0x278] sm:$0xff] }
 0x16b   : > { %4125 = vmatprep.subr.bf16.mxu0 %v4124_v16  ;;  %v4242_v12 = vpack.c.bf16 %v3452_v11, %v3450_v10 }
 0x16d   : > { %3965 = vmatmul.mubr.msk.f32.vlgmr.msra.gmra.mrb[20].mxu0 %vm402_vm1, %v1527_v22  ;;  %v3458_v22 = vld [vmem:[%s6217_s8 + $0x260] sm:$0xff] }
 0x16e   : > { %3967 = vmatprep.mubr.msk.f32.mxu0 %vm402_vm1, %v1528_v24  ;;  %4127 = vmatpush3.bf16.msra.mxu0 %v4124_v16  ;;  %v3454_v16 = vld [vmem:[%s6217_s8 + $0x240] sm:$0xff]  ;;  %v3465_v24 = vld [vmem:[%s6217_s8 + $0x298] sm:$0xff] }
 0x16f   : > { %4129 = vmatprep.subr.bf16.mxu0 %v4128_v21  ;;  %v4246_v19 = vpack.c.bf16 %v3456_v17, %v3454_v16  ;;  %v1893_v16 = vld [vmem:[%s6215_s6 + $0x28] sm:$0xff]  ;;  %v1895_v17 = vld [vmem:[%s6215_s6 + $0x38] sm:$0xff] }
 0x171   : > { %3968 = vmatmul.mubr.msk.f32.gmra.mrb[22].mxu0 %vm402_vm1, %v1529_v26  ;;  %v4252_v26 = vpack.c.bf16 %v3465_v24, %v3463_v47 }
 0x172   : > { %3970 = vmatprep.mubr.msk.f32.mxu0 %vm402_vm1, %v1530_v29  ;;  %4131 = vmatpush3.bf16.msra.mxu0 %v4128_v21  ;;  %v4248_v21 = vpack.c.bf16 %v3461_v20, %v3459_v18  ;;  %v3467_v29 = vld [vmem:[%s6217_s8 + $0x2a8] sm:$0xff]  ;;  %v4272_v20 = vpack.c.bf16 %v3485_v8, %v3483_v7  ;;  %v1908_v7 = vld [vmem:[%s6215_s6 + $0xa0] sm:$0xff]  ;;  %v1910_v8 = vld [vmem:[%s6215_s6 + $0xb0] sm:$0xff] }
 0x173   : > { %4133 = vmatprep.subr.bf16.mxu0 %v4132_v25 }
 0x175   : > { %3971 = vmatmul.mubr.msk.f32.gmra.mrb[24].mxu0 %vm402_vm1, %v1531_v31  ;;  %v4254_v31 = vpack.c.bf16 %v3464_v28, %v3462_v27 }
 0x176   : > { %3973 = vmatprep.mubr.msk.f32.mxu0 %vm402_vm1, %v1532_v32  ;;  %4135 = vmatpush3.bf16.msra.mxu0 %v4132_v25  ;;  %v4250_v25 = vpack.c.bf16 %v3460_v23, %v3458_v22  ;;  %v3484_v22 = vld [vmem:[%s6217_s8 + $0x330] sm:$0xff] }
 0x177   : > { %4137 = vmatprep.subr.bf16.mxu0 %v4136_v30 }
 0x179   : > { %3974 = vmatmul.mubr.msk.f32.gmra.mrb[26].mxu0 %vm402_vm1, %v1533_v33  ;;  %v3466_v33 = vld [vmem:[%s6217_s8 + $0x2a0] sm:$0xff] }
 0x17a   : > { %4139 = vmatpush3.bf16.msra.mxu0 %v4136_v30  ;;  %3992 = vmatprep.mubr.msk.f32.mxu0 %vm402_vm1, %v1680_v34  ;;  %v3469_v30 = vld [vmem:[%s6217_s8 + $0x2b8] sm:$0xff]  ;;  %v3468_v34 = vld [vmem:[%s6217_s8 + $0x2b0] sm:$0xff] }
 0x17b   : > { %4237 = vmatprep.subr.bf16.mxu0 %v4236_v2  ;;  %v4256_v32 = vpack.c.bf16 %v3469_v30, %v3467_v29  ;;  %v3478_v2 = vld [vmem:[%s6217_s8 + $0x300] sm:$0xff]  ;;  %v4176_v30 = vpack.c.bf16 %v1895_v17, %v1893_v16  ;;  %v1914_v17 = vld [vmem:[%s6215_s6 + $0xd0] sm:$0xff] }
 0x17c   : > { %v4270_v18 = vpack.c.bf16 %v3480_v3, %v3478_v2  ;;  %v1909_v2 = vld [vmem:[%s6215_s6 + $0xa8] sm:$0xff]  ;;  %v1911_v3 = vld [vmem:[%s6215_s6 + $0xb8] sm:$0xff]  ;;  %v1912_v16 = vld [vmem:[%s6215_s6 + $0xc0] sm:$0xff] }
 0x17d   : > { %3993 = vmatmul.mubr.msk.f32.vlgmr.msra.gmra.mrb[20].mxu0 %vm402_vm1, %v1681_v35  ;;  %v3471_v35 = vld [vmem:[%s6217_s8 + $0x2c8] sm:$0xff] }
 0x17e   : > { %3995 = vmatprep.mubr.msk.f32.mxu0 %vm402_vm1, %v1682_v36  ;;  %4239 = vmatpush1.bf16.msra.mxu0 %v4238_v5  ;;  %v3473_v36 = vld [vmem:[%s6217_s8 + $0x2d8] sm:$0xff] }
 0x17f   : > { %4241 = vmatprep.subr.bf16.mxu0 %v4240_v9 }
 0x181   : > { %3996 = vmatmul.mubr.msk.f32.gmra.mrb[22].mxu0 %vm402_vm1, %v1683_v37  ;;  %v5186_v37 = vld [vmem:[%s6214_s5] ss:$0 sm:$0xff] }
 0x182   : > { %3998 = vmatprep.mubr.msk.f32.mxu0 %vm402_vm1, %v1684_v38  ;;  %4243 = vmatpush1.bf16.msra.mxu0 %v4242_v12  ;;  %v4258_v38 = vpack.c.bf16 %v3468_v34, %v3466_v33  ;;  %v1888_v12 = vld [vmem:[%s6215_s6] sm:$0xff] }
 0x183   : > { %4245 = vmatprep.subr.bf16.mxu0 %v4244_v15  ;;  %v4174_v24 = vpack.c.bf16 %v1890_v13, %v1888_v12  ;;  %v1915_v12 = vld [vmem:[%s6215_s6 + $0xd8] sm:$0xff]  ;;  %v4194_v13 = vpack.c.bf16 %v1910_v8, %v1908_v7 }
 0x185   : > { %3999 = vmatmul.mubr.msk.f32.gmra.mrb[24].mxu0 %vm402_vm1, %v1685_v39  ;;  %v4260_v39 = vpack.c.bf16 %v3473_v36, %v3471_v35  ;;  %v1897_v36 = vld [vmem:[%s6215_s6 + $0x48] sm:$0xff] }
 0x186   : > { %4001 = vmatprep.mubr.msk.f32.mxu0 %vm402_vm1, %v1686_v40  ;;  %4247 = vmatpush1.bf16.msra.mxu0 %v4246_v19  ;;  %v3470_v40 = vld [vmem:[%s6217_s8 + $0x2c0] sm:$0xff] }
 0x187   : > { %4249 = vmatprep.subr.bf16.mxu0 %v4248_v21  ;;  %v3482_v21 = vld [vmem:[%s6217_s8 + $0x320] sm:$0xff] }
 0x189   : > { %4002 = vmatmul.mubr.msk.f32.gmra.mrb[26].mxu0 %vm402_vm1, %v1687_v41  ;;  %v3472_v41 = vld [vmem:[%s6217_s8 + $0x2d0] sm:$0xff] }
 0x18a   : > { %4251 = vmatpush1.bf16.msra.mxu0 %v4250_v25  ;;  %v4262_v50 = vpack.c.bf16 %v3472_v41, %v3470_v40  ;;  %v3487_v25 = vld [vmem:[%s6217_s8 + $0x348] sm:$0xff] }
 0x18b   : > { %4253 = vmatprep.subr.bf16.mxu0 %v4252_v26  ;;  %v3489_v26 = vld [vmem:[%s6217_s8 + $0x358] sm:$0xff] }
 0x18c   : > { %v4276_v41 = vpack.c.bf16 %v3489_v26, %v3487_v25  ;;  %v3415_v25 = vld [vmem:[%s6215_s6 + $0x208] sm:$0xff]  ;;  %v3417_v26 = vld [vmem:[%s6215_s6 + $0x218] sm:$0xff] }
 0x18e   : > { %4255 = vmatpush1.bf16.msra.mxu0 %v4254_v31  ;;  %v1892_v31 = vld [vmem:[%s6215_s6 + $0x20] sm:$0xff] }
 0x18f   : > { %4257 = vmatprep.subr.bf16.mxu0 %v4256_v32  ;;  %v1894_v32 = vld [vmem:[%s6215_s6 + $0x30] sm:$0xff] }
 0x192   : > { %4259 = vmatpush1.bf16.msra.mxu0 %v4258_v38  ;;  %v1899_v38 = vld [vmem:[%s6215_s6 + $0x58] sm:$0xff] }
 0x193   : > { %4261 = vmatprep.subr.bf16.mxu0 %v4260_v39  ;;  %v4274_v39 = vpack.c.bf16 %v3484_v22, %v3482_v21  ;;  %v4180_v44 = vpack.c.bf16 %v1899_v38, %v1897_v36  ;;  %v4198_v21 = vpack.c.bf16 %v1914_v17, %v1912_v16  ;;  %v3418_v38 = vld [vmem:[%s6215_s6 + $0x220] sm:$0xff]  ;;  %v2431_v17 = vld [vmem:[%s6217_s8 + $0x10] sm:$0xff] }
 0x194   : > { %v2429_v16 = vld [vmem:[%s6217_s8] sm:$0xff] }
 0x196   : > { %4263 = vmatpush1.bf16.msra.mxu0 %v4262_v50 }
 0x197   : > { %4265 = vmatprep.subr.bf16.mxu0 %v4264_v52  ;;  %v1903_v52 = vld [vmem:[%s6215_s6 + $0x78] sm:$0xff] }
 0x19a   : > { %4267 = vmatpush1.bf16.msra.mxu0 %v4266_v63  ;;  %v1904_v63 = vld [vmem:[%s6215_s6 + $0x80] sm:$0xff] }
 0x19b   : > { %4269 = vmatprep.subr.bf16.mxu0 %v4268_v1 }
 0x19e   : > { %4271 = vmatpush1.bf16.msra.mxu0 %v4270_v18 }
 0x19f   : > { %4273 = vmatprep.subr.bf16.mxu0 %v4272_v20  ;;  %v1919_v20 = vld [vmem:[%s6215_s6 + $0xf8] sm:$0xff] }
 0x1a2   : > { %4275 = vmatpush1.bf16.msra.mxu0 %v4274_v39  ;;  %v3420_v39 = vld [vmem:[%s6215_s6 + $0x230] sm:$0xff] }
 0x1a3   : > { %4277 = vmatprep.subr.bf16.mxu0 %v4276_v41  ;;  %v3425_v41 = vld [vmem:[%s6215_s6 + $0x258] sm:$0xff] }
 0x250   : > { %v3994_v42 = vpop.f32.mrb[20].mxu0 }
 0x251   : > { %v1842_v45 = vadd.f32 %v3994_v42, %v5186_v37  ;;  %v1787_v48 = vpop.f32.mrb[21].mxu0  ;;  %v4178_v42 = vpack.c.bf16 %v1894_v32, %v1892_v31  ;;  %v3416_v31 = vld [vmem:[%s6215_s6 + $0x210] sm:$0xff]  ;;  %v3419_v32 = vld [vmem:[%s6215_s6 + $0x228] sm:$0xff] }
 0x252   : > { %v1841_v49 = vadd.f32 %v5186_v37, %v1787_v48  ;;  %v1898_v48 = vld [vmem:[%s6215_s6 + $0x50] sm:$0xff] }
 0x253   : > { %vm1850_vm1 = vcmp.gt.f32.partialorder %v1842_v45, 0.0  ;;  %v1858_v51 = vmul.f32 0.01, %v1842_v45 }
 0x254   : > { %vm1849_vm5 = vcmp.gt.f32.partialorder %v1841_v49, 0.0  ;;  %v1857_v55 = vmul.f32 0.01, %v1841_v49  ;;  %v3997_v56 = vpop.f32.mrb[22].mxu0 }
 0x255   : > { %v5214_v58 = vsel %vm1850_vm1, %v1842_v45, %v1858_v51  ;;  %v1844_v59 = vadd.f32 %v3997_v56, %v5186_v37  ;;  %v1797_v60 = vpop.f32.mrb[23].mxu0  ;;  %v1896_v45 = vld [vmem:[%s6215_s6 + $0x40] sm:$0xff]  ;;  %v1901_v51 = vld [vmem:[%s6215_s6 + $0x68] sm:$0xff]  ;;  %v1902_v56 = vld [vmem:[%s6215_s6 + $0x70] sm:$0xff] }
 0x256   : > { %1874 = vst [vmem:[#allocation4 + $0x8] sm:$0xff] %v5214_v58  ;;  %v5218_v61 = vsel %vm1849_vm5, %v1841_v49, %v1857_v55  ;;  %v1843_v62 = vadd.f32 %v5186_v37, %v1797_v60  ;;  %v4182_v53 = vpack.c.bf16 %v1898_v48, %v1896_v45  ;;  %v4184_v54 = vpack.c.bf16 %v1903_v52, %v1901_v51  ;;  %v1900_v55 = vld [vmem:[%s6215_s6 + $0x60] sm:$0xff]  ;;  %v3427_v45 = vld [vmem:[%s6215_s6 + $0x268] sm:$0xff]  ;;  %v3428_v52 = vld [vmem:[%s6215_s6 + $0x270] sm:$0xff] }
 0x257   : > { %1873 = vst [vmem:[#allocation4] sm:$0xff] %v5218_v61  ;;  %vm1852_vm6 = vcmp.gt.f32.partialorder %v1844_v59, 0.0  ;;  %v1860_v0 = vmul.f32 0.01, %v1844_v59  ;;  %v4186_v60 = vpack.c.bf16 %v1902_v56, %v1900_v55  ;;  %v3426_v51 = vld [vmem:[%s6215_s6 + $0x260] sm:$0xff] }
 0x258   : > { %vm1851_vm7 = vcmp.gt.f32.partialorder %v1843_v62, 0.0  ;;  %v1859_v4 = vmul.f32 0.01, %v1843_v62  ;;  %v4000_v5 = vpop.f32.mrb[24].mxu0  ;;  %v3430_v56 = vld [vmem:[%s6215_s6 + $0x280] sm:$0xff] }
 0x259   : > { %v5234_v9 = vsel %vm1852_vm6, %v1844_v59, %v1860_v0  ;;  %v1846_v10 = vadd.f32 %v4000_v5, %v5186_v37  ;;  %v1807_v11 = vpop.f32.mrb[25].mxu0  ;;  %v1907_v59 = vld [vmem:[%s6215_s6 + $0x98] sm:$0xff]  ;;  %v1906_v0 = vld [vmem:[%s6215_s6 + $0x90] sm:$0xff]  ;;  %v4192_v5 = vpack.c.bf16 %v1911_v3, %v1909_v2  ;;  %v3438_v3 = vld [vmem:[%s6215_s6 + $0x2c0] sm:$0xff] }
 0x25a   : > { %1876 = vst [vmem:[#allocation4 + $0x18] sm:$0xff] %v5234_v9  ;;  %v5244_v14 = vsel %vm1851_vm7, %v1843_v62, %v1859_v4  ;;  %v1845_v15 = vadd.f32 %v5186_v37, %v1807_v11  ;;  %v4188_v62 = vpack.c.bf16 %v1907_v59, %v1905_v46  ;;  %v4190_v4 = vpack.c.bf16 %v1906_v0, %v1904_v63  ;;  %v1913_v11 = vld [vmem:[%s6215_s6 + $0xc8] sm:$0xff]  ;;  %v3436_v63 = vld [vmem:[%s6215_s6 + $0x2b0] sm:$0xff] }
 0x25b   : > { %1875 = vst [vmem:[#allocation4 + $0x10] sm:$0xff] %v5244_v14  ;;  %vm1854_vm8 = vcmp.gt.f32.partialorder %v1846_v10, 0.0  ;;  %v1862_v19 = vmul.f32 0.01, %v1846_v10  ;;  %v3435_v46 = vld [vmem:[%s6215_s6 + $0x2a8] sm:$0xff] }
 0x25c   : > { %vm1853_vm9 = vcmp.gt.f32.partialorder %v1845_v15, 0.0  ;;  %v1861_v23 = vmul.f32 0.01, %v1845_v15  ;;  %v4003_v47 = vpop.f32.mrb[26].mxu0  ;;  %v3439_v0 = vld [vmem:[%s6215_s6 + $0x2c8] sm:$0xff] }
 0x25d   : > { %v5266_v27 = vsel %vm1854_vm8, %v1846_v10, %v1862_v19  ;;  %v1848_v28 = vadd.f32 %v4003_v47, %v5186_v37  ;;  %v1817_v29 = vpop.f32.mrb[27].mxu0  ;;  %v1917_v19 = vld [vmem:[%s6215_s6 + $0xe8] sm:$0xff]  ;;  %v1918_v47 = vld [vmem:[%s6215_s6 + $0xf0] sm:$0xff] }
 0x25e   : > { %1878 = vst [vmem:[#allocation4 + $0x28] sm:$0xff] %v5266_v27  ;;  %v5276_v33 = vsel %vm1853_vm9, %v1845_v15, %v1861_v23  ;;  %v1847_v34 = vadd.f32 %v5186_v37, %v1817_v29  ;;  %v1920_v35 = vld [vmem:[#allocation4 + $0x1] sm:$0xff]  ;;  %v4196_v15 = vpack.c.bf16 %v1915_v12, %v1913_v11  ;;  %v4200_v22 = vpack.c.bf16 %v1919_v20, %v1917_v19  ;;  %v1916_v23 = vld [vmem:[%s6215_s6 + $0xe0] sm:$0xff]  ;;  %v2430_v12 = vld [vmem:[%s6217_s8 + $0x8] sm:$0xff] }
 0x25f   : > { %1877 = vst [vmem:[#allocation4 + $0x20] sm:$0xff] %v5276_v33  ;;  %vm1856_vm10 = vcmp.gt.f32.partialorder %v1848_v28, 0.0  ;;  %v1864_v40 = vmul.f32 0.01, %v1848_v28  ;;  %2025 = vmatmul.mubr.f32.vlgmr.msra.gmra.mrb[16].mxu1 %v1920_v35  ;;  %v4204_v29 = vpack.c.bf16 %v3417_v26, %v3415_v25  ;;  %v3444_v11 = vld [vmem:[%s6215_s6 + $0x2f0] sm:$0xff]  ;;  %v4302_v19 = vpack.c.bf16 %v2431_v17, %v2429_v16  ;;  %v2472_v16 = vld [vmem:[%s6217_s8 + $0x158] sm:$0xff] }
 0x260   : > { %vm1855_vm11 = vcmp.gt.f32.partialorder %v1847_v34, 0.0  ;;  %v1863_v37 = vmul.f32 0.01, %v1847_v34  ;;  %4175 = vmatpush1.bf16.msra.mxu1 %v4174_v24  ;;  %2030 = vmatprep.mubr.f32.mxu1 %v4559_v6 }
 0x261   : > { %v1872_v43 = vsel %vm1856_vm10, %v1848_v28, %v1864_v40  ;;  %4177 = vmatprep.subr.bf16.mxu1 %v4176_v30  ;;  %v4202_v28 = vpack.c.bf16 %v1918_v47, %v1916_v23  ;;  %v3414_v30 = vld [vmem:[%s6215_s6 + $0x200] sm:$0xff]  ;;  %v3423_v40 = vld [vmem:[%s6215_s6 + $0x248] sm:$0xff]  ;;  %v2174_v23 = vld [vmem:[#allocation4 + $0x2] sm:$0xff] }
 0x262   : > { %1880 = vst [vmem:[#allocation4 + $0x38] sm:$0xff] %v1872_v43  ;;  %v5293_v49 = vsel %vm1855_vm11, %v1847_v34, %v1863_v37  ;;  %v1921_v50 = vld [vmem:[#allocation4 + $0x9] sm:$0xff]  ;;  %v1922_v57 = vld [vmem:[#allocation4 + $0x11] sm:$0xff]  ;;  %v4206_v35 = vpack.c.bf16 %v3416_v31, %v3414_v30  ;;  %v4210_v37 = vpack.c.bf16 %v3420_v39, %v3418_v38  ;;  %v2443_v38 = vld [vmem:[%s6217_s8 + $0x70] sm:$0xff] }
 0x263   : > { %1879 = vst [vmem:[#allocation4 + $0x30] sm:$0xff] %v5293_v49  ;;  %2031 = vmatmul.mubr.f32.gmra.mrb[18].mxu1 %v1921_v50  ;;  %v3421_v34 = vld [vmem:[%s6215_s6 + $0x238] sm:$0xff]  ;;  %v3422_v43 = vld [vmem:[%s6215_s6 + $0x240] sm:$0xff]  ;;  %v2438_v47 = vld [vmem:[%s6217_s8 + $0x48] sm:$0xff] }
 0x264   : > { %4179 = vmatpush1.bf16.msra.mxu1 %v4178_v42  ;;  %2036 = vmatprep.mubr.f32.mxu1 %v4559_v6  ;;  %v4208_v36 = vpack.c.bf16 %v3421_v34, %v3419_v32  ;;  %v4212_v42 = vpack.c.bf16 %v3425_v41, %v3423_v40  ;;  %v2175_v30 = vld [vmem:[#allocation4 + $0xa] sm:$0xff]  ;;  %v2442_v31 = vld [vmem:[%s6217_s8 + $0x68] sm:$0xff] }
 0x265   : > { %4181 = vmatprep.subr.bf16.mxu1 %v4180_v44  ;;  %v3424_v44 = vld [vmem:[%s6215_s6 + $0x250] sm:$0xff]  ;;  %v2444_v32 = vld [vmem:[%s6217_s8 + $0x78] sm:$0xff]  ;;  %v2176_v39 = vld [vmem:[#allocation4 + $0x12] sm:$0xff] }
 0x266   : > { %v1923_v1 = vld [vmem:[#allocation4 + $0x19] sm:$0xff]  ;;  %v1924_v10 = vld [vmem:[#allocation4 + $0x21] sm:$0xff]  ;;  %v4214_v48 = vpack.c.bf16 %v3424_v44, %v3422_v43  ;;  %v2445_v43 = vld [vmem:[%s6217_s8 + $0x80] sm:$0xff] }
 0x267   : > { %2037 = vmatmul.mubr.f32.gmra.mrb[20].mxu1 %v1922_v57  ;;  %v3432_v57 = vld [vmem:[%s6215_s6 + $0x290] sm:$0xff]  ;;  %v2446_v40 = vld [vmem:[%s6217_s8 + $0x88] sm:$0xff]  ;;  %v2448_v41 = vld [vmem:[%s6217_s8 + $0x98] sm:$0xff] }
 0x268   : > { %4183 = vmatpush1.bf16.msra.mxu1 %v4182_v53  ;;  %2042 = vmatprep.mubr.f32.mxu1 %v4559_v6  ;;  %v3431_v53 = vld [vmem:[%s6215_s6 + $0x288] sm:$0xff]  ;;  %v4222_v59 = vpack.c.bf16 %v3432_v57, %v3430_v56  ;;  %v2447_v44 = vld [vmem:[%s6217_s8 + $0x90] sm:$0xff] }
 0x269   : > { %4185 = vmatprep.subr.bf16.mxu1 %v4184_v54  ;;  %v4218_v54 = vpack.c.bf16 %v3428_v52, %v3426_v51  ;;  %v2449_v52 = vld [vmem:[%s6217_s8 + $0xa0] sm:$0xff] }
 0x26a   : > { %v1925_v18 = vld [vmem:[#allocation4 + $0x29] sm:$0xff]  ;;  %v1926_v24 = vld [vmem:[#allocation4 + $0x31] sm:$0xff] }
 0x26b   : > { %2043 = vmatmul.mubr.f32.gmra.mrb[22].mxu1 %v1923_v1 }
 0x26c   : > { %4187 = vmatpush1.bf16.msra.mxu1 %v4186_v60  ;;  %2048 = vmatprep.mubr.f32.mxu1 %v4559_v6 }
 0x26d   : > { %4189 = vmatprep.subr.bf16.mxu1 %v4188_v62  ;;  %v3434_v62 = vld [vmem:[%s6215_s6 + $0x2a0] sm:$0xff] }
 0x26e   : > { %v4226_v1 = vpack.c.bf16 %v3436_v63, %v3434_v62  ;;  %v2460_v62 = vld [vmem:[%s6217_s8 + $0xf8] sm:$0xff] }
 0x26f   : > { %2049 = vmatmul.mubr.f32.gmra.mrb[24].mxu1 %v1924_v10  ;;  %v3442_v10 = vld [vmem:[%s6215_s6 + $0x2e0] sm:$0xff] }
 0x270   : > { %4191 = vmatpush1.bf16.msra.mxu1 %v4190_v4  ;;  %2054 = vmatprep.mubr.f32.mxu1 %v4559_v6  ;;  %v3440_v4 = vld [vmem:[%s6215_s6 + $0x2d0] sm:$0xff] }
 0x271   : > { %4193 = vmatprep.subr.bf16.mxu1 %v4192_v5  ;;  %v3443_v5 = vld [vmem:[%s6215_s6 + $0x2e8] sm:$0xff]  ;;  %v4230_v7 = vpack.c.bf16 %v3440_v4, %v3438_v3 }
 0x272   : > { %v2462_v3 = vld [vmem:[%s6217_s8 + $0x108] sm:$0xff] }
 0x273   : > { %2055 = vmatmul.mubr.f32.gmra.mrb[26].mxu1 %v1925_v18  ;;  %v2434_v18 = vld [vmem:[%s6217_s8 + $0x28] sm:$0xff] }
 0x274   : > { %4195 = vmatpush1.bf16.msra.mxu1 %v4194_v13  ;;  %2060 = vmatprep.mubr.f32.mxu1 %v4559_v6  ;;  %v4234_v13 = vpack.c.bf16 %v3444_v11, %v3442_v10  ;;  %v2468_v10 = vld [vmem:[%s6217_s8 + $0x138] sm:$0xff] }
 0x275   : > { %4197 = vmatprep.subr.bf16.mxu1 %v4196_v15 }
 0x277   : > { %2061 = vmatmul.mubr.f32.gmra.mrb[28].mxu1 %v1926_v24  ;;  %v2440_v24 = vld [vmem:[%s6217_s8 + $0x58] sm:$0xff] }
 0x278   : > { %4199 = vmatpush1.bf16.msra.mxu1 %v4198_v21  ;;  %2131 = vmatprep.mubr.f32.mxu1 %v4559_v6  ;;  %v2433_v21 = vld [vmem:[%s6217_s8 + $0x20] sm:$0xff]  ;;  %v4308_v26 = vpack.c.bf16 %v2440_v24, %v2438_v47  ;;  %v2475_v24 = vld [vmem:[%s6217_s8 + $0x170] sm:$0xff] }
 0x279   : > { %4201 = vmatprep.subr.bf16.mxu1 %v4200_v22  ;;  %v2435_v22 = vld [vmem:[%s6217_s8 + $0x30] sm:$0xff]  ;;  %v2473_v47 = vld [vmem:[%s6217_s8 + $0x160] sm:$0xff] }
 0x27a   : > { %v4306_v25 = vpack.c.bf16 %v2435_v22, %v2433_v21  ;;  %v2476_v21 = vld [vmem:[%s6217_s8 + $0x178] sm:$0xff] }
 0x27c   : > { %4203 = vmatpush1.bf16.msra.mxu1 %v4202_v28  ;;  %v2437_v28 = vld [vmem:[%s6217_s8 + $0x40] sm:$0xff] }
 0x27d   : > { %4205 = vmatprep.subr.bf16.mxu1 %v4204_v29  ;;  %v2439_v29 = vld [vmem:[%s6217_s8 + $0x50] sm:$0xff] }
 0x27e   : > { %v4310_v34 = vpack.c.bf16 %v2439_v29, %v2437_v28  ;;  %v4346_v28 = vpack.c.bf16 %v2475_v24, %v2473_v47 }
 0x27f   : > { %2132 = vmatmul.mubr.f32.vlgmr.msra.gmra.mrb[16].mxu1 %v5218_v61  ;;  %v3429_v61 = vld [vmem:[%s6215_s6 + $0x278] sm:$0xff] }
 0x280   : > { %4207 = vmatpush1.bf16.msra.mxu1 %v4206_v35  ;;  %2137 = vmatprep.mubr.f32.mxu1 %v4559_v6  ;;  %v4216_v50 = vpack.c.bf16 %v3429_v61, %v3427_v45  ;;  %v4312_v35 = vpack.c.bf16 %v2444_v32, %v2442_v31  ;;  %v2177_v45 = vld [vmem:[#allocation4 + $0x1a] sm:$0xff] }
 0x281   : > { %4209 = vmatprep.subr.bf16.mxu1 %v4208_v36  ;;  %v2441_v36 = vld [vmem:[%s6217_s8 + $0x60] sm:$0xff]  ;;  %v2450_v61 = vld [vmem:[%s6217_s8 + $0xa8] sm:$0xff]  ;;  %v2479_v31 = vld [vmem:[%s6217_s8 + $0x190] sm:$0xff] }
 0x283   : > { %2138 = vmatmul.mubr.f32.gmra.mrb[18].mxu1 %v5214_v58  ;;  %v3433_v58 = vld [vmem:[%s6215_s6 + $0x298] sm:$0xff] }
 0x284   : > { %4211 = vmatpush1.bf16.msra.mxu1 %v4210_v37  ;;  %2143 = vmatprep.mubr.f32.mxu1 %v4559_v6  ;;  %v4220_v55 = vpack.c.bf16 %v3433_v58, %v3431_v53  ;;  %v4314_v37 = vpack.c.bf16 %v2443_v38, %v2441_v36  ;;  %v2451_v53 = vld [vmem:[%s6217_s8 + $0xb0] sm:$0xff]  ;;  %v3486_v36 = vld [vmem:[%s6217_s8 + $0x340] sm:$0xff] }
 0x285   : > { %4213 = vmatprep.subr.bf16.mxu1 %v4212_v42  ;;  %v4316_v42 = vpack.c.bf16 %v2448_v41, %v2446_v40  ;;  %v2178_v58 = vld [vmem:[#allocation4 + $0x22] sm:$0xff]  ;;  %v4322_v56 = vpack.c.bf16 %v2451_v53, %v2449_v52  ;;  %v2481_v40 = vld [vmem:[%s6217_s8 + $0x1a0] sm:$0xff] }
 0x286   : > { %v3488_v38 = vld [vmem:[%s6217_s8 + $0x350] sm:$0xff] }
 0x287   : > { %2144 = vmatmul.mubr.f32.gmra.mrb[20].mxu1 %v5244_v14  ;;  %v3437_v14 = vld [vmem:[%s6215_s6 + $0x2b8] sm:$0xff]  ;;  %v4278_v41 = vpack.c.bf16 %v3488_v38, %v3486_v36  ;;  %v3515_v36 = vld [vmem:[%s6217_s8 + $0x428] sm:$0xff] }
 0x288   : > { %4215 = vmatpush1.bf16.msra.mxu1 %v4214_v48  ;;  %2149 = vmatprep.mubr.f32.mxu1 %v4559_v6  ;;  %v4224_v60 = vpack.c.bf16 %v3437_v14, %v3435_v46  ;;  %v2452_v48 = vld [vmem:[%s6217_s8 + $0xb8] sm:$0xff]  ;;  %v2453_v46 = vld [vmem:[%s6217_s8 + $0xc0] sm:$0xff]  ;;  %v2455_v14 = vld [vmem:[%s6217_s8 + $0xd0] sm:$0xff] }
 0x289   : > { %4217 = vmatprep.subr.bf16.mxu1 %v4216_v50  ;;  %v4318_v50 = vpack.c.bf16 %v2447_v44, %v2445_v43  ;;  %v4320_v51 = vpack.c.bf16 %v2452_v48, %v2450_v61  ;;  %v4326_v63 = vpack.c.bf16 %v2455_v14, %v2453_v46  ;;  %4279 = vmatpush1.bf16.msra.mxu0 %v4278_v41  ;;  %v3491_v43 = vld [vmem:[%s6217_s8 + $0x368] sm:$0xff]  ;;  %v3493_v44 = vld [vmem:[%s6217_s8 + $0x378] sm:$0xff]  ;;  %v3490_v48 = vld [vmem:[%s6217_s8 + $0x360] sm:$0xff] }
 0x28a   : > { %v4280_v61 = vpack.c.bf16 %v3493_v44, %v3491_v43  ;;  %v2490_v46 = vld [vmem:[%s6217_s8 + $0x1e8] sm:$0xff]  ;;  %v3517_v38 = vld [vmem:[%s6217_s8 + $0x438] sm:$0xff]  ;;  %v5780_v41 = vld [vmem:[%s6217_s8 + $0x430] sm:$0xff] }
 0x28b   : > { %2150 = vmatmul.mubr.f32.gmra.mrb[22].mxu1 %v5234_v9  ;;  %v3441_v9 = vld [vmem:[%s6215_s6 + $0x2d8] sm:$0xff]  ;;  %v5795_v44 = vld [vmem:[%s6217_s8 + $0x440] sm:$0xff] }
 0x28c   : > { %4219 = vmatpush1.bf16.msra.mxu1 %v4218_v54  ;;  %2155 = vmatprep.mubr.f32.mxu1 %v4559_v6  ;;  %v4228_v2 = vpack.c.bf16 %v3441_v9, %v3439_v0  ;;  %v2454_v54 = vld [vmem:[%s6217_s8 + $0xc8] sm:$0xff]  ;;  %v2457_v9 = vld [vmem:[%s6217_s8 + $0xe0] sm:$0xff] }
 0x28d   : > { %4221 = vmatprep.subr.bf16.mxu1 %v4220_v55  ;;  %v2456_v55 = vld [vmem:[%s6217_s8 + $0xd8] sm:$0xff]  ;;  %4281 = vmatprep.subr.bf16.mxu0 %v4280_v61  ;;  %v5805_v61 = vld [vmem:[%s6217_s8 + $0x468] sm:$0xff] }
 0x28e   : > { %v4324_v57 = vpack.c.bf16 %v2456_v55, %v2454_v54  ;;  %v2487_v54 = vld [vmem:[%s6217_s8 + $0x1d0] sm:$0xff] }
 0x28f   : > { %2156 = vmatmul.mubr.f32.gmra.mrb[24].mxu1 %v5276_v33  ;;  %v3445_v33 = vld [vmem:[%s6215_s6 + $0x2f8] sm:$0xff] }
 0x290   : > { %4223 = vmatpush1.bf16.msra.mxu1 %v4222_v59  ;;  %2161 = vmatprep.mubr.f32.mxu1 %v4559_v6  ;;  %v4232_v8 = vpack.c.bf16 %v3445_v33, %v3443_v5  ;;  %v2179_v59 = vld [vmem:[#allocation4 + $0x2a] sm:$0xff] }
 0x291   : > { %4225 = vmatprep.subr.bf16.mxu1 %v4224_v60  ;;  %v2458_v60 = vld [vmem:[%s6217_s8 + $0xe8] sm:$0xff]  ;;  %v2461_v33 = vld [vmem:[%s6217_s8 + $0x100] sm:$0xff] }
 0x292   : > { %v4328_v0 = vpack.c.bf16 %v2460_v62, %v2458_v60  ;;  %v3496_v60 = vld [vmem:[%s6217_s8 + $0x390] sm:$0xff]  ;;  %v2492_v62 = vld [vmem:[%s6217_s8 + $0x1f8] sm:$0xff] }
 0x293   : > { %2162 = vmatmul.mubr.f32.gmra.mrb[26].mxu1 %v5266_v27  ;;  %v2432_v27 = vld [vmem:[%s6217_s8 + $0x18] sm:$0xff] }
 0x294   : > { %4227 = vmatpush1.bf16.msra.mxu1 %v4226_v1  ;;  %2167 = vmatprep.mubr.f32.mxu1 %v4559_v6  ;;  %v4300_v15 = vpack.c.bf16 %v2432_v27, %v2430_v12  ;;  %v2459_v1 = vld [vmem:[%s6217_s8 + $0xf0] sm:$0xff]  ;;  %v2465_v27 = vld [vmem:[%s6217_s8 + $0x120] sm:$0xff] }
 0x295   : > { %4229 = vmatprep.subr.bf16.mxu1 %v4228_v2  ;;  %v2180_v2 = vld [vmem:[#allocation4 + $0x32] sm:$0xff]  ;;  %v4330_v4 = vpack.c.bf16 %v2459_v1, %v2457_v9  ;;  %v2491_v1 = vld [vmem:[%s6217_s8 + $0x1f0] sm:$0xff] }
 0x296   : > { %v2489_v9 = vld [vmem:[%s6217_s8 + $0x1e0] sm:$0xff] }
 0x297   : > { %2168 = vmatmul.mubr.f32.gmra.mrb[28].mxu1 %v5293_v49  ;;  %v2436_v49 = vld [vmem:[%s6217_s8 + $0x38] sm:$0xff] }
 0x298   : > { %4231 = vmatpush1.bf16.msra.mxu1 %v4230_v7  ;;  %2278 = vmatprep.mubr.f32.mxu1 %v4559_v6  ;;  %v4304_v20 = vpack.c.bf16 %v2436_v49, %v2434_v18  ;;  %v2463_v7 = vld [vmem:[%s6217_s8 + $0x110] sm:$0xff]  ;;  %v2469_v49 = vld [vmem:[%s6217_s8 + $0x140] sm:$0xff] }
 0x299   : > { %4233 = vmatprep.subr.bf16.mxu1 %v4232_v8  ;;  %v2466_v8 = vld [vmem:[%s6217_s8 + $0x128] sm:$0xff]  ;;  %v4334_v11 = vpack.c.bf16 %v2463_v7, %v2461_v33  ;;  %v3498_v33 = vld [vmem:[%s6217_s8 + $0x3a0] sm:$0xff]  ;;  %v3500_v7 = vld [vmem:[%s6217_s8 + $0x3b0] sm:$0xff] }
 0x29a   : > { %v4336_v12 = vpack.c.bf16 %v2468_v10, %v2466_v8  ;;  %v3513_v8 = vld [vmem:[%s6217_s8 + $0x418] sm:$0xff]  ;;  %v4290_v10 = vpack.c.bf16 %v3500_v7, %v3498_v33 }
 0x29c   : > { %4235 = vmatpush1.bf16.msra.mxu1 %v4234_v13  ;;  %v2467_v13 = vld [vmem:[%s6217_s8 + $0x130] sm:$0xff] }
 0x29d   : > { %4301 = vmatprep.subr.bf16.mxu1 %v4300_v15  ;;  %v2470_v15 = vld [vmem:[%s6217_s8 + $0x148] sm:$0xff]  ;;  %v4338_v17 = vpack.c.bf16 %v2467_v13, %v2465_v27  ;;  %v3505_v27 = vld [vmem:[%s6217_s8 + $0x3d8] sm:$0xff] }
 0x29e   : > { %v4340_v18 = vpack.c.bf16 %v2472_v16, %v2470_v15  ;;  %v3502_v15 = vld [vmem:[%s6217_s8 + $0x3c0] sm:$0xff]  ;;  %v3504_v16 = vld [vmem:[%s6217_s8 + $0x3d0] sm:$0xff] }
 0x29f   : > { %2279 = vmatmul.mubr.f32.vlgmr.msra.gmra.mrb[16].mxu1 %v2174_v23 }
 0x2a0   : > { %2284 = vmatprep.mubr.f32.mxu1 %v4559_v6  ;;  %4303 = vmatpush1.bf16.msra.mxu1 %v4302_v19  ;;  %v2471_v19 = vld [vmem:[%s6217_s8 + $0x150] sm:$0xff] }
 0x2a1   : > { %4305 = vmatprep.subr.bf16.mxu1 %v4304_v20  ;;  %v2474_v20 = vld [vmem:[%s6217_s8 + $0x168] sm:$0xff]  ;;  %v4342_v22 = vpack.c.bf16 %v2471_v19, %v2469_v49  ;;  %v3509_v49 = vld [vmem:[%s6217_s8 + $0x3f8] sm:$0xff] }
 0x2a2   : > { %v4344_v23 = vpack.c.bf16 %v2476_v21, %v2474_v20  ;;  %v3506_v20 = vld [vmem:[%s6217_s8 + $0x3e0] sm:$0xff]  ;;  %v3508_v21 = vld [vmem:[%s6217_s8 + $0x3f0] sm:$0xff] }
 0x2a3   : > { %2285 = vmatmul.mubr.f32.gmra.mrb[18].mxu1 %v2175_v30  ;;  %v2477_v30 = vld [vmem:[%s6217_s8 + $0x180] sm:$0xff] }
 0x2a4   : > { %2290 = vmatprep.mubr.f32.mxu1 %v4559_v6  ;;  %4307 = vmatpush1.bf16.msra.mxu1 %v4306_v25  ;;  %v2478_v25 = vld [vmem:[%s6217_s8 + $0x188] sm:$0xff]  ;;  %v4350_v32 = vpack.c.bf16 %v2479_v31, %v2477_v30  ;;  %v3510_v31 = vld [vmem:[%s6217_s8 + $0x400] sm:$0xff] }
 0x2a5   : > { %4309 = vmatprep.subr.bf16.mxu1 %v4308_v26  ;;  %v2480_v26 = vld [vmem:[%s6217_s8 + $0x198] sm:$0xff] }
 0x2a6   : > { %v4348_v29 = vpack.c.bf16 %v2480_v26, %v2478_v25  ;;  %v2335_v25 = vld [vmem:[%s6216_s7] sm:$0x3] }
 0x2a7   : > { %2291 = vmatmul.mubr.f32.gmra.mrb[20].mxu1 %v2176_v39 }
 0x2a8   : > { %2296 = vmatprep.mubr.f32.mxu1 %v4559_v6  ;;  %4311 = vmatpush1.bf16.msra.mxu1 %v4310_v34  ;;  %v2482_v34 = vld [vmem:[%s6217_s8 + $0x1a8] sm:$0xff] }
 0x2a9   : > { %4313 = vmatprep.subr.bf16.mxu1 %v4312_v35  ;;  %v2484_v35 = vld [vmem:[%s6217_s8 + $0x1b8] sm:$0xff] }
 0x2aa   : > { %v4352_v39 = vpack.c.bf16 %v2484_v35, %v2482_v34  ;;  %v3512_v35 = vld [vmem:[%s6217_s8 + $0x410] sm:$0xff] }
 0x2ab   : > { %2297 = vmatmul.mubr.f32.gmra.mrb[22].mxu1 %v2177_v45  ;;  %v2486_v45 = vld [vmem:[%s6217_s8 + $0x1c8] sm:$0xff] }
 0x2ac   : > { %2302 = vmatprep.mubr.f32.mxu1 %v4559_v6  ;;  %4315 = vmatpush1.bf16.msra.mxu1 %v4314_v37  ;;  %v2483_v37 = vld [vmem:[%s6217_s8 + $0x1b0] sm:$0xff] }
 0x2ad   : > { %4317 = vmatprep.subr.bf16.mxu1 %v4316_v42  ;;  %v4354_v42 = vpack.c.bf16 %v2483_v37, %v2481_v40  ;;  %v5775_v40 = vld [vmem:[%s6217_s8 + $0x420] sm:$0xff]  ;;  %v5785_v37 = vld [vmem:[%s6217_s8 + $0x448] sm:$0xff] }
 0x2af   : > { %2303 = vmatmul.mubr.f32.gmra.mrb[24].mxu1 %v2178_v58  ;;  %v2485_v58 = vld [vmem:[%s6217_s8 + $0x1c0] sm:$0xff] }
 0x2b0   : > { %2308 = vmatprep.mubr.f32.mxu1 %v4559_v6  ;;  %4319 = vmatpush1.bf16.msra.mxu1 %v4318_v50  ;;  %v3492_v50 = vld [vmem:[%s6217_s8 + $0x370] sm:$0xff]  ;;  %v4358_v55 = vpack.c.bf16 %v2487_v54, %v2485_v58 }
 0x2b1   : > { %4321 = vmatprep.subr.bf16.mxu1 %v4320_v51  ;;  %v2488_v51 = vld [vmem:[%s6217_s8 + $0x1d8] sm:$0xff]  ;;  %v4282_v52 = vpack.c.bf16 %v3492_v50, %v3490_v48 }
 0x2b2   : > { %v4356_v53 = vpack.c.bf16 %v2488_v51, %v2486_v45  ;;  %v5800_v45 = vld [vmem:[%s6217_s8 + $0x450] sm:$0xff]  ;;  %v5810_v48 = vld [vmem:[%s6217_s8 + $0x478] sm:$0xff] }
 0x2b3   : > { %2309 = vmatmul.mubr.f32.gmra.mrb[26].mxu1 %v2179_v59  ;;  %4283 = vmatpush1.bf16.msra.mxu0 %v4282_v52  ;;  %v3494_v59 = vld [vmem:[%s6217_s8 + $0x380] sm:$0xff] }
 0x2b4   : > { %2314 = vmatprep.mubr.f32.mxu1 %v4559_v6  ;;  %4323 = vmatpush1.bf16.msra.mxu1 %v4322_v56  ;;  %v2464_v6 = vld [vmem:[%s6217_s8 + $0x118] sm:$0xff]  ;;  %v3495_v56 = vld [vmem:[%s6217_s8 + $0x388] sm:$0xff]  ;;  %v5815_v52 = vld [vmem:[%s6217_s8 + $0x460] sm:$0xff] }
 0x2b5   : > { %4325 = vmatprep.subr.bf16.mxu1 %v4324_v57  ;;  %v4332_v5 = vpack.c.bf16 %v2464_v6, %v2462_v3  ;;  %v3497_v57 = vld [vmem:[%s6217_s8 + $0x398] sm:$0xff]  ;;  %v3499_v3 = vld [vmem:[%s6217_s8 + $0x3a8] sm:$0xff] }
 0x2b6   : > { %v4284_v14 = vpack.c.bf16 %v3497_v57, %v3495_v56  ;;  %v3501_v6 = vld [vmem:[%s6217_s8 + $0x3b8] sm:$0xff]  ;;  %v4366_v56 = vpack.c.bf16 %v3512_v35, %v3510_v31  ;;  %v5826_v57 = vld [vmem:[%s6217_s8 + $0x488] sm:$0xff] }
 0x2b7   : > { %2315 = vmatmul.mubr.f32.gmra.mrb[28].mxu1 %v2180_v2  ;;  %v4362_v2 = vpack.c.bf16 %v2491_v1, %v2489_v9  ;;  %v5852_v9 = vld [vmem:[%s6217_s8 + $0x4b8] sm:$0xff] }
 0x2b8   : > { %4327 = vmatpush1.bf16.msra.mxu1 %v4326_v63  ;;  %v4286_v63 = vpack.c.bf16 %v3496_v60, %v3494_v59  ;;  %4285 = vmatprep.subr.bf16.mxu0 %v4284_v14  ;;  %v5836_v14 = vld [vmem:[%s6217_s8 + $0x480] sm:$0xff] }
 0x2b9   : > { %4329 = vmatprep.subr.bf16.mxu1 %v4328_v0  ;;  %v4360_v0 = vpack.c.bf16 %v2492_v62, %v2490_v46  ;;  %v5831_v46 = vld [vmem:[%s6217_s8 + $0x498] sm:$0xff]  ;;  %v4368_v62 = vpack.c.bf16 %v3517_v38, %v3515_v36 }
 0x2ba   : > { %4287 = vmatpush1.bf16.msra.mxu0 %v4286_v63  ;;  %v5842_v63 = vld [vmem:[%s6217_s8 + $0x490] sm:$0xff] }
 0x2bc   : > { %4331 = vmatpush1.bf16.msra.mxu1 %v4330_v4  ;;  %v3511_v4 = vld [vmem:[%s6217_s8 + $0x408] sm:$0xff] }
 0x2bd   : > { %4333 = vmatprep.subr.bf16.mxu1 %v4332_v5  ;;  %v4288_v5 = vpack.c.bf16 %v3501_v6, %v3499_v3  ;;  %v5861_v6 = vld [vmem:[%s6217_s8 + $0x4a0] sm:$0xff] }
 0x2bf   : > { %4289 = vmatprep.subr.bf16.mxu0 %v4288_v5  ;;  %v5871_v5 = vld [vmem:[%s6217_s8 + $0x4c8] sm:$0xff] }
 0x2c0   : > { %4335 = vmatpush1.bf16.msra.mxu1 %v4334_v11  ;;  %v4364_v11 = vpack.c.bf16 %v3513_v8, %v3511_v4  ;;  %4291 = vmatpush1.bf16.msra.mxu0 %v4290_v10  ;;  %v5866_v4 = vld [vmem:[%s6217_s8 + $0x4b0] sm:$0xff]  ;;  %v4374_v8 = vpack.c.bf16 %v5800_v45, %v5795_v44  ;;  %v4376_v10 = vpack.c.bf16 %v5810_v48, %v5805_v61 }
 0x2c1   : > { %4337 = vmatprep.subr.bf16.mxu1 %v4336_v12  ;;  %v3503_v12 = vld [vmem:[%s6217_s8 + $0x3c8] sm:$0xff]  ;;  %v4386_v31 = vpack.c.bf16 %v5866_v4, %v5861_v6  ;;  %v3540_v6 = vld [vmem:[%s6217_s8 + $0x4f0] sm:$0xff] }
 0x2c2   : > { %v4292_v13 = vpack.c.bf16 %v3505_v27, %v3503_v12  ;;  %v5885_v12 = vld [vmem:[%s6217_s8 + $0x4c0] sm:$0xff] }
 0x2c4   : > { %4339 = vmatpush1.bf16.msra.mxu1 %v4338_v17  ;;  %v4294_v17 = vpack.c.bf16 %v3504_v16, %v3502_v15  ;;  %4293 = vmatprep.subr.bf16.mxu0 %v4292_v13 }
 0x2c5   : > { %4341 = vmatprep.subr.bf16.mxu1 %v4340_v18  ;;  %v3507_v18 = vld [vmem:[%s6217_s8 + $0x3e8] sm:$0xff] }
 0x2c6   : > { %4295 = vmatpush1.bf16.msra.mxu0 %v4294_v17  ;;  %v4296_v19 = vpack.c.bf16 %v3509_v49, %v3507_v18  ;;  %v4380_v17 = vpack.c.bf16 %v5831_v46, %v5826_v57  ;;  %v5898_v18 = vld [vmem:[%s6217_s8 + $0x4d0] sm:$0xff]  ;;  %v5903_v49 = vld [vmem:[%s6217_s8 + $0x4e8] sm:$0xff] }
 0x2c7   : > { %v4390_v36 = vpack.c.bf16 %v5898_v18, %v5885_v12  ;;  %v3547_v12 = vld [vmem:[%s6217_s8 + $0x528] sm:$0xff]  ;;  %v3549_v18 = vld [vmem:[%s6217_s8 + $0x538] sm:$0xff] }
 0x2c8   : > { %4343 = vmatpush1.bf16.msra.mxu1 %v4342_v22  ;;  %v4298_v22 = vpack.c.bf16 %v3508_v21, %v3506_v20  ;;  %4297 = vmatprep.subr.bf16.mxu0 %v4296_v19  ;;  %v5908_v19 = vld [vmem:[%s6217_s8 + $0x4f8] sm:$0xff] }
 0x2c9   : > { %4345 = vmatprep.subr.bf16.mxu1 %v4344_v23  ;;  %v2337_v23 = vlaneseq  ;;  %v4392_v38 = vpack.c.bf16 %v5908_v19, %v5903_v49 }
 0x2ca   : > { %4299 = vmatpush1.bf16.msra.mxu0 %v4298_v22  ;;  %v4382_v22 = vpack.c.bf16 %v5842_v63, %v5836_v14 }
 0x2cb   : > { %v5743_v47 = vshrl.u32 %v2337_v23, 7 }
 0x2cc   : > { %4347 = vmatpush1.bf16.msra.mxu1 %v4346_v28 }
 0x2cd   : > { %4349 = vmatprep.subr.bf16.mxu1 %v4348_v29  ;;  %v2339_v24 = vsub.s32 0, %v5743_v47  ;;  %v2343_v26 = vsub.s32 1, %v5743_v47 }
 0x2cf   : > { %v5752_v28 = vrot.slane %v2335_v25, %v2339_v24  ;;  %v5756_v29 = vrot.slane %v2335_v25, %v2343_v26 }
 0x2d0   : > { %4351 = vmatpush1.bf16.msra.mxu1 %v4350_v32 }
 0x2d1   : > { %4353 = vmatprep.subr.bf16.mxu1 %v4352_v39 }
 0x2d4   : > { %4355 = vmatpush1.bf16.msra.mxu1 %v4354_v42  ;;  %v5790_v42 = vld [vmem:[%s6217_s8 + $0x458] sm:$0xff] }
 0x2d5   : > { %4357 = vmatprep.subr.bf16.mxu1 %v4356_v53  ;;  %v5820_v53 = vld [vmem:[%s6217_s8 + $0x470] sm:$0xff]  ;;  %v4372_v3 = vpack.c.bf16 %v5790_v42, %v5785_v37 }
 0x2d6   : > { %v4378_v16 = vpack.c.bf16 %v5820_v53, %v5815_v52 }
 0x2d8   : > { %4359 = vmatpush1.bf16.msra.mxu1 %v4358_v55 }
 0x2d9   : > { %4361 = vmatprep.subr.bf16.mxu1 %v4360_v0  ;;  %v5847_v0 = vld [vmem:[%s6217_s8 + $0x4a8] sm:$0xff] }
 0x2da   : > { %v4384_v25 = vpack.c.bf16 %v5852_v9, %v5847_v0 }
 0x2dc   : > { %4363 = vmatpush1.bf16.msra.mxu1 %v4362_v2  ;;  %v4370_v2 = vpack.c.bf16 %v5780_v41, %v5775_v40 }
 0x2dd   : > { %4365 = vmatprep.subr.bf16.mxu1 %v4364_v11  ;;  %v5880_v11 = vld [vmem:[%s6217_s8 + $0x4d8] sm:$0xff] }
 0x372   : > { %v2280_v30 = vpop.f32.mrb[16].mxu1 }
 0x373   : > { %v2347_v32 = vadd.f32 %v5752_v28, %v2280_v30  ;;  %v2282_v34 = vpop.f32.mrb[17].mxu1 }
 0x374   : > { %v2348_v39 = vadd.f32 %v5756_v29, %v2282_v34 }
 0x375   : > { %vm2361_vm12 = vcmp.gt.f32.partialorder %v2347_v32, 0.0  ;;  %v2375_v43 = vmul.f32 0.01, %v2347_v32 }
 0x376   : > { %vm2362_vm13 = vcmp.gt.f32.partialorder %v2348_v39, 0.0  ;;  %v2376_v50 = vmul.f32 0.01, %v2348_v39  ;;  %v2286_v51 = vpop.f32.mrb[18].mxu1 }
 0x377   : > { %v2389_v58 = vsel %vm2361_vm12, %v2347_v32, %v2375_v43  ;;  %v2349_v54 = vadd.f32 %v5752_v28, %v2286_v51  ;;  %v2288_v55 = vpop.f32.mrb[19].mxu1  ;;  %v4388_v32 = vpack.c.bf16 %v5880_v11, %v5871_v5  ;;  %v3543_v5 = vld [vmem:[%s6217_s8 + $0x508] sm:$0xff]  ;;  %v3545_v11 = vld [vmem:[%s6217_s8 + $0x518] sm:$0xff] }
 0x378   : > { %2403 = vst [vmem:[#allocation5] sm:$0xff] %v2389_v58  ;;  %v2390_v59 = vsel %vm2362_vm13, %v2348_v39, %v2376_v50  ;;  %v2350_v60 = vadd.f32 %v5756_v29, %v2288_v55 }
 0x379   : > { %2404 = vst [vmem:[#allocation5 + $0x8] sm:$0xff] %v2390_v59  ;;  %vm2363_vm15 = vcmp.gt.f32.partialorder %v2349_v54, 0.0  ;;  %v2377_v1 = vmul.f32 0.01, %v2349_v54  ;;  %2790 = vmatprep.mubr.f32.mxu1 %v2390_v59 }
 0x37a   : > { %vm2364_vm0 = vcmp.gt.f32.partialorder %v2350_v60, 0.0  ;;  %v2378_v33 = vmul.f32 0.01, %v2350_v60  ;;  %v2292_v7 = vpop.f32.mrb[20].mxu1  ;;  %2791 = vmatmul.mubr.f32.vlgmr.msra.gmra.mrb[30].mxu1 %v2389_v58 }
 0x37b   : > { %v5888_v27 = vsel %vm2363_vm15, %v2349_v54, %v2377_v1  ;;  %v2351_v13 = vadd.f32 %v5752_v28, %v2292_v7  ;;  %v2294_v15 = vpop.f32.mrb[21].mxu1  ;;  %4367 = vmatpush1.bf16.msra.mxu1 %v4366_v56 }
 0x37c   : > { %v5911_v20 = vsel %vm2364_vm0, %v2350_v60, %v2378_v33  ;;  %v2352_v21 = vadd.f32 %v5756_v29, %v2294_v15  ;;  %4369 = vmatprep.subr.bf16.mxu1 %v4368_v62  ;;  %v2588_v43 = vrot.slane %v5888_v27, 1 }
 0x37d   : > { %vm2365_vm3 = vcmp.gt.f32.partialorder %v2351_v13, 0.0  ;;  %v2379_v30 = vmul.f32 0.01, %v2351_v13  ;;  %2796 = vmatprep.mubr.f32.mxu1 %v5911_v20  ;;  %v2591_v37 = vrot.slane %v5911_v20, 1 }
 0x37e   : > { %vm2366_vm4 = vcmp.gt.f32.partialorder %v2352_v21, 0.0  ;;  %v2380_v34 = vmul.f32 0.01, %v2352_v21  ;;  %v2298_v35 = vpop.f32.mrb[22].mxu1  ;;  %2797 = vmatmul.mubr.f32.gmra.mrb[32].mxu1 %v5888_v27 }
 0x37f   : > { %v5928_v39 = vsel %vm2365_vm3, %v2351_v13, %v2379_v30  ;;  %v2353_v40 = vadd.f32 %v5752_v28, %v2298_v35  ;;  %v2300_v41 = vpop.f32.mrb[23].mxu1  ;;  %4371 = vmatpush1.bf16.msra.mxu1 %v4370_v2  ;;  %v2493_v42 = vld [vmem:[#allocation5] sm:$0xfe] }
 0x380   : > { %v5933_v44 = vsel %vm2366_vm4, %v2352_v21, %v2380_v34  ;;  %v2354_v45 = vadd.f32 %v5756_v29, %v2300_v41  ;;  %v2494_v61 = vld [vmem:[#allocation5 + $0x8] sm:$0xfe]  ;;  %v2587_v48 = vrot.slane %v2493_v42, 1  ;;  %4373 = vmatprep.subr.bf16.mxu1 %v4372_v3  ;;  %v2593_v50 = vrot.slane %v5928_v39, 1 }
 0x381   : > { %v2828_v51 = vld [vmem:[#allocation5 + $0x8] sm:$0xfc]  ;;  %vm2367_vm1 = vcmp.gt.f32.partialorder %v2353_v40, 0.0  ;;  %v2381_v58 = vmul.f32 0.01, %v2353_v40  ;;  %v2590_v54 = vrot.slane %v2494_v61, 1  ;;  %2802 = vmatprep.mubr.f32.mxu1 %v5933_v44 }
 0x382   : > { %v2595_v55 = vrot.slane %v5933_v44, 1  ;;  %vm2368_vm5 = vcmp.gt.f32.partialorder %v2354_v45, 0.0  ;;  %v2382_v56 = vmul.f32 0.01, %v2354_v45  ;;  %v2304_v59 = vpop.f32.mrb[24].mxu1  ;;  %v2589_v60 = vsel %vm2586_vm14, %v2587_v48, %v2588_v43  ;;  %2803 = vmatmul.mubr.f32.gmra.mrb[34].mxu1 %v5928_v39 }
 0x383   : > { %v2594_v62 = vsel %vm2586_vm14, %v2588_v43, %v2593_v50  ;;  %v5942_v1 = vsel %vm2367_vm1, %v2353_v40, %v2381_v58  ;;  %v2355_v2 = vadd.f32 %v5752_v28, %v2304_v59  ;;  %v2306_v3 = vpop.f32.mrb[25].mxu1  ;;  %v2592_v33 = vsel %vm2586_vm14, %v2590_v54, %v2591_v37  ;;  %4375 = vmatpush1.bf16.msra.mxu1 %v4374_v8 }
 0x384   : > { %v2596_v7 = vsel %vm2586_vm14, %v2591_v37, %v2595_v55  ;;  %v5947_v13 = vsel %vm2368_vm5, %v2354_v45, %v2382_v56  ;;  %v2356_v15 = vadd.f32 %v5756_v29, %v2306_v3  ;;  %2689 = vmatprep.mubr.f32.mxu0 %v2592_v33  ;;  %4377 = vmatprep.subr.bf16.mxu1 %v4376_v10  ;;  %v2597_v21 = vrot.slane %v5942_v1, 1 }
 0x385   : > { %v2904_v30 = vrot.slane %v2828_v51, 2  ;;  %vm2369_vm6 = vcmp.gt.f32.partialorder %v2355_v2, 0.0  ;;  %v2383_v34 = vmul.f32 0.01, %v2355_v2  ;;  %2690 = vmatmul.mubr.f32.vlgmr.msra.gmra.mrb[28].mxu0 %v2589_v60  ;;  %2808 = vmatprep.mubr.f32.mxu1 %v5947_v13  ;;  %v2599_v35 = vrot.slane %v5947_v13, 1 }
 0x386   : > { %v2905_v8 = vrot.slane %v5911_v20, 2  ;;  %vm2370_vm7 = vcmp.gt.f32.partialorder %v2356_v15, 0.0  ;;  %v2384_v40 = vmul.f32 0.01, %v2356_v15  ;;  %v2310_v41 = vpop.f32.mrb[26].mxu1  ;;  %2695 = vmatprep.mubr.f32.mxu0 %v2596_v7  ;;  %2809 = vmatmul.mubr.f32.gmra.mrb[36].mxu1 %v5942_v1  ;;  %v2598_v10 = vsel %vm2586_vm14, %v2593_v50, %v2597_v21 }
 0x387   : > { %v2902_v37 = vrot.slane %v5888_v27, 2  ;;  %v5957_v42 = vsel %vm2369_vm6, %v2355_v2, %v2383_v34  ;;  %v2357_v43 = vadd.f32 %v5752_v28, %v2310_v41  ;;  %v2312_v45 = vpop.f32.mrb[27].mxu1  ;;  %4379 = vmatpush1.bf16.msra.mxu1 %v4378_v16  ;;  %v2600_v20 = vsel %vm2586_vm14, %v2595_v55, %v2599_v35  ;;  %v3544_v41 = vld [vmem:[%s6217_s8 + $0x510] sm:$0xff] }
 0x388   : > { %v2906_v61 = vsel %vm2900_vm2, %v2904_v30, %v2905_v8  ;;  %v5965_v48 = vsel %vm2370_vm7, %v2356_v15, %v2384_v40  ;;  %v2358_v51 = vadd.f32 %v5756_v29, %v2312_v45  ;;  %4381 = vmatprep.subr.bf16.mxu1 %v4380_v17  ;;  %v2601_v50 = vrot.slane %v5957_v42, 1  ;;  %v3542_v40 = vld [vmem:[%s6217_s8 + $0x500] sm:$0xff] }
 0x389   : > { %v2909_v58 = vrot.slane %v5933_v44, 2  ;;  %vm2371_vm8 = vcmp.gt.f32.partialorder %v2357_v43, 0.0  ;;  %v2385_v54 = vmul.f32 0.01, %v2357_v43  ;;  %2696 = vmatmul.mubr.f32.gmra.mrb[30].mxu0 %v2594_v62  ;;  %2814 = vmatprep.mubr.f32.mxu1 %v5965_v48  ;;  %v2603_v52 = vrot.slane %v5965_v48, 1 }
 0x38a   : > { %v2907_v53 = vrot.slane %v5928_v39, 2  ;;  %vm2372_vm9 = vcmp.gt.f32.partialorder %v2358_v51, 0.0  ;;  %v2386_v16 = vmul.f32 0.01, %v2358_v51  ;;  %v2316_v55 = vpop.f32.mrb[28].mxu1  ;;  %2701 = vmatprep.mubr.f32.mxu0 %v2600_v20  ;;  %2815 = vmatmul.mubr.f32.gmra.mrb[38].mxu1 %v5957_v42  ;;  %v2602_v57 = vsel %vm2586_vm14, %v2597_v21, %v2601_v50  ;;  %v3551_v20 = vld [vmem:[%s6217_s8 + $0x548] sm:$0xff] }
 0x38b   : > { %v5979_v46 = vsel %vm2900_vm2, %v2905_v8, %v2909_v58  ;;  %v5981_v17 = vsel %vm2371_vm8, %v2357_v43, %v2385_v54  ;;  %v2359_v44 = vadd.f32 %v5752_v28, %v2316_v55  ;;  %v2318_v56 = vpop.f32.mrb[29].mxu1  ;;  %4383 = vmatpush1.bf16.msra.mxu1 %v4382_v22  ;;  %v2604_v39 = vsel %vm2586_vm14, %v2599_v35, %v2603_v52  ;;  %v3548_v43 = vld [vmem:[%s6217_s8 + $0x530] sm:$0xff]  ;;  %v3550_v54 = vld [vmem:[%s6217_s8 + $0x540] sm:$0xff] }
 0x38c   : > { %v5991_v59 = vsel %vm2900_vm2, %v2902_v37, %v2907_v53  ;;  %v5993_v60 = vsel %vm2372_vm9, %v2358_v51, %v2386_v16  ;;  %v2360_v62 = vadd.f32 %v5756_v29, %v2318_v56  ;;  %4385 = vmatprep.subr.bf16.mxu1 %v4384_v25  ;;  %v2605_v28 = vrot.slane %v5981_v17, 1  ;;  %v3557_v16 = vld [vmem:[%s6217_s8 + $0x578] sm:$0xff]  ;;  %v3556_v56 = vld [vmem:[%s6217_s8 + $0x570] sm:$0xff] }
 0x38d   : > { %v2913_v14 = vrot.slane %v5947_v13, 2  ;;  %vm2373_vm10 = vcmp.gt.f32.partialorder %v2359_v44, 0.0  ;;  %v2387_v63 = vmul.f32 0.01, %v2359_v44  ;;  %2702 = vmatmul.mubr.f32.gmra.mrb[32].mxu0 %v2598_v10  ;;  %2820 = vmatprep.mubr.f32.mxu1 %v5993_v60  ;;  %v2607_v22 = vrot.slane %v5993_v60, 1  ;;  %v3538_v13 = vld [vmem:[%s6217_s8 + $0x4e0] sm:$0xff] }
 0x38e   : > { %v2911_v2 = vrot.slane %v5942_v1, 2  ;;  %vm2374_vm11 = vcmp.gt.f32.partialorder %v2360_v62, 0.0  ;;  %v2388_v3 = vmul.f32 0.01, %v2360_v62  ;;  %2707 = vmatprep.mubr.f32.mxu0 %v2604_v39  ;;  %2821 = vmatmul.mubr.f32.gmra.mrb[40].mxu1 %v5981_v17  ;;  %v2606_v29 = vsel %vm2586_vm14, %v2601_v50, %v2605_v28  ;;  %v3559_v39 = vld [vmem:[%s6217_s8 + $0x588] sm:$0xff] }
 0x38f   : > { %v6009_v0 = vsel %vm2900_vm2, %v2909_v58, %v2913_v14  ;;  %v2401_v9 = vsel %vm2373_vm10, %v2359_v44, %v2387_v63  ;;  %4387 = vmatpush1.bf16.msra.mxu1 %v4386_v31  ;;  %3003 = vmatprep.mubr.f32.mxu1 %v2906_v61  ;;  %v2608_v25 = vsel %vm2586_vm14, %v2603_v52, %v2607_v22  ;;  %v2917_v33 = vrot.slane %v5965_v48, 2  ;;  %v3553_v61 = vld [vmem:[%s6217_s8 + $0x558] sm:$0xff]  ;;  %v3552_v52 = vld [vmem:[%s6217_s8 + $0x550] sm:$0xff]  ;;  %v3554_v44 = vld [vmem:[%s6217_s8 + $0x560] sm:$0xff] }
 0x390   : > { %v6016_v1 = vsel %vm2900_vm2, %v2907_v53, %v2911_v2  ;;  %2415 = vst [vmem:[#allocation5 + $0x60] sm:$0xff] %v2401_v9  ;;  %v2402_v7 = vsel %vm2374_vm11, %v2360_v62, %v2388_v3  ;;  %4389 = vmatprep.subr.bf16.mxu1 %v4388_v32  ;;  %v2915_v4 = vrot.slane %v5957_v42, 2  ;;  %v2921_v31 = vrot.slane %v5993_v60, 2  ;;  %v3546_v42 = vld [vmem:[%s6217_s8 + $0x520] sm:$0xff]  ;;  %v3555_v53 = vld [vmem:[%s6217_s8 + $0x568] sm:$0xff]  ;;  %v3561_v62 = vld [vmem:[%s6217_s8 + $0x598] sm:$0xff] }
 0x391   : > { %v2919_v15 = vrot.slane %v5981_v17, 2  ;;  %2416 = vst [vmem:[#allocation5 + $0x68] sm:$0xff] %v2402_v7  ;;  %2708 = vmatmul.mubr.f32.gmra.mrb[34].mxu0 %v2602_v57  ;;  %v6038_v32 = vsel %vm2900_vm2, %v2913_v14, %v2917_v33  ;;  %v4394_v35 = vpack.c.bf16 %v3540_v6, %v3538_v13  ;;  %v4396_v8 = vpack.c.bf16 %v3545_v11, %v3543_v5  ;;  %v3558_v63 = vld [vmem:[%s6217_s8 + $0x580] sm:$0xff]  ;;  %v3565_v3 = vld [vmem:[%s6217_s8 + $0x5b8] sm:$0xff]  ;;  %v3567_v7 = vld [vmem:[%s6217_s8 + $0x5c8] sm:$0xff] }
 0x392   : > { %2713 = vmatprep.mubr.f32.mxu0 %v2608_v25  ;;  %v6041_v21 = vsel %vm2900_vm2, %v2911_v2, %v2915_v4  ;;  %v6046_v30 = vsel %vm2900_vm2, %v2917_v33, %v2921_v31  ;;  %v4398_v19 = vpack.c.bf16 %v3544_v41, %v3542_v40  ;;  %v4400_v10 = vpack.c.bf16 %v3549_v18, %v3547_v12  ;;  %v3563_v2 = vld [vmem:[%s6217_s8 + $0x5a8] sm:$0xff]  ;;  %v3562_v25 = vld [vmem:[%s6217_s8 + $0x5a0] sm:$0xff]  ;;  %v3564_v33 = vld [vmem:[%s6217_s8 + $0x5b0] sm:$0xff] }
 0x393   : > { %v6051_v34 = vsel %vm2900_vm2, %v2915_v4, %v2919_v15  ;;  %4391 = vmatpush1.bf16.msra.mxu1 %v4390_v36  ;;  %v4402_v51 = vpack.c.bf16 %v3548_v43, %v3546_v42  ;;  %v4404_v58 = vpack.c.bf16 %v3553_v61, %v3551_v20  ;;  %v4406_v55 = vpack.c.bf16 %v3552_v52, %v3550_v54  ;;  %v3569_v13 = vld [vmem:[%s6217_s8 + $0x5d8] sm:$0xff]  ;;  %v3566_v5 = vld [vmem:[%s6217_s8 + $0x5c0] sm:$0xff]  ;;  %v3568_v11 = vld [vmem:[%s6217_s8 + $0x5d0] sm:$0xff] }
 0x394   : > { %4393 = vmatprep.subr.bf16.mxu1 %v4392_v38  ;;  %v4408_v57 = vpack.c.bf16 %v3557_v16, %v3555_v53  ;;  %v4412_v14 = vpack.c.bf16 %v3561_v62, %v3559_v39  ;;  %v4416_v9 = vpack.c.bf16 %v3565_v3, %v3563_v2  ;;  %v4418_v6 = vpack.c.bf16 %v3564_v33, %v3562_v25  ;;  %v3570_v12 = vld [vmem:[%s6217_s8 + $0x5e0] sm:$0xff]  ;;  %v3572_v18 = vld [vmem:[%s6217_s8 + $0x5f0] sm:$0xff] }
 0x395   : > { %2714 = vmatmul.mubr.f32.gmra.mrb[36].mxu0 %v2606_v29  ;;  %v4420_v4 = vpack.c.bf16 %v3569_v13, %v3567_v7  ;;  %v4422_v40 = vpack.c.bf16 %v3568_v11, %v3566_v5  ;;  %v3052_v17 = vld [vmem:[%s6218_s9] sm:$0x3]  ;;  %vm3181_vm9 = vcmp.lt.s32.totalorder %v2337_v23, 256 }
 0x397   : > { %v2505_v49 = vld [vmem:[#allocation5 + $0x60] sm:$0x1]  ;;  %4395 = vmatpush1.bf16.msra.mxu1 %v4394_v35  ;;  %v3571_v35 = vld [vmem:[%s6217_s8 + $0x5e8] sm:$0xff] }
 0x398   : > { %v2506_v36 = vld [vmem:[#allocation5 + $0x68] sm:$0x1]  ;;  %v2609_v38 = vrot.slane %v2505_v49, 1  ;;  %4397 = vmatprep.subr.bf16.mxu1 %v4396_v8  ;;  %v2827_v49 = vld [vmem:[#allocation5] sm:$0xfc] }
 0x399   : > { %v2611_v45 = vrot.slane %v2506_v36, 1  ;;  %v3573_v8 = vld [vmem:[%s6217_s8 + $0x5f8] sm:$0xff]  ;;  %v2901_v36 = vrot.slane %v2827_v49, 2  ;;  %v2829_v43 = vld [vmem:[#allocation5 + $0x60] sm:$0x3] }
 0x39a   : > { %v2610_v50 = vsel %vm2586_vm14, %v2605_v28, %v2609_v38  ;;  %v4410_v28 = vpack.c.bf16 %v3556_v56, %v3554_v44  ;;  %v4424_v41 = vpack.c.bf16 %v3573_v8, %v3571_v35  ;;  %v2923_v27 = vrot.slane %v2829_v43, 2 }
 0x39b   : > { %v2612_v48 = vsel %vm2586_vm14, %v2607_v22, %v2611_v45  ;;  %4399 = vmatpush1.bf16.msra.mxu1 %v4398_v19  ;;  %v3560_v22 = vld [vmem:[%s6217_s8 + $0x590] sm:$0xff]  ;;  %v4426_v19 = vpack.c.bf16 %v3572_v18, %v3570_v12  ;;  %v2903_v38 = vsel %vm2900_vm2, %v2901_v36, %v2902_v37 }
 0x39c   : > { %2719 = vmatprep.mubr.f32.mxu0 %v2612_v48  ;;  %4401 = vmatprep.subr.bf16.mxu1 %v4400_v10  ;;  %v4414_v29 = vpack.c.bf16 %v3560_v22, %v3558_v63  ;;  %v2830_v10 = vld [vmem:[#allocation5 + $0x68] sm:$0x3] }
 0x39d   : > { %2720 = vmatmul.mubr.f32.gmra.mrb[38].mxu0 %v2610_v50  ;;  %v2925_v42 = vrot.slane %v2830_v10, 2 }
 0x39f   : > { %4403 = vmatpush1.bf16.msra.mxu1 %v4402_v51  ;;  %v2926_v37 = vsel %vm2900_vm2, %v2921_v31, %v2925_v42  ;;  %v6179_v31 = vrot.slane %v3052_v17, %v2339_v24  ;;  %v6183_v51 = vrot.slane %v3052_v17, %v2343_v26 }
 0x3a0   : > { %4405 = vmatprep.subr.bf16.mxu1 %v4404_v58 }
 0x3a3   : > { %4407 = vmatpush1.bf16.msra.mxu1 %v4406_v55 }
 0x3a4   : > { %4409 = vmatprep.subr.bf16.mxu1 %v4408_v57 }
 0x3a7   : > { %4411 = vmatpush1.bf16.msra.mxu1 %v4410_v28 }
 0x3a8   : > { %4413 = vmatprep.subr.bf16.mxu1 %v4412_v14 }
 0x3ab   : > { %4415 = vmatpush1.bf16.msra.mxu1 %v4414_v29 }
 0x3ac   : > { %4417 = vmatprep.subr.bf16.mxu1 %v4416_v9 }
 0x3af   : > { %4419 = vmatpush1.bf16.msra.mxu1 %v4418_v6 }
 0x3b0   : > { %4421 = vmatprep.subr.bf16.mxu1 %v4420_v4 }
 0x3b3   : > { %4423 = vmatpush1.bf16.msra.mxu1 %v4422_v40 }
 0x3b4   : > { %4425 = vmatprep.subr.bf16.mxu1 %v4424_v41 }
 0x3b7   : > { %4427 = vmatpush1.bf16.msra.mxu1 %v4426_v19 }
 0x3ba   : > { %3004 = vmatmul.mubr.f32.vlgmr.msra.gmra.mrb[30].mxu1 %v2903_v38 }
 0x3bb   : > { %3009 = vmatprep.mubr.f32.mxu1 %v5979_v46  ;;  %v2924_v46 = vsel %vm2900_vm2, %v2919_v15, %v2923_v27 }
 0x3be   : > { %3010 = vmatmul.mubr.f32.gmra.mrb[32].mxu1 %v5991_v59 }
 0x3bf   : > { %3015 = vmatprep.mubr.f32.mxu1 %v6009_v0 }
 0x3c2   : > { %3016 = vmatmul.mubr.f32.gmra.mrb[34].mxu1 %v6016_v1 }
 0x3c3   : > { %3021 = vmatprep.mubr.f32.mxu1 %v6038_v32 }
 0x3c6   : > { %3022 = vmatmul.mubr.f32.gmra.mrb[36].mxu1 %v6041_v21 }
 0x3c7   : > { %3027 = vmatprep.mubr.f32.mxu1 %v6046_v30 }
 0x3ca   : > { %3028 = vmatmul.mubr.f32.gmra.mrb[38].mxu1 %v6051_v34 }
 0x3cb   : > { %3033 = vmatprep.mubr.f32.mxu1 %v2926_v37 }
 0x3ce   : > { %3034 = vmatmul.mubr.f32.gmra.mrb[40].mxu1 %v2924_v46 }
 0x458   : > { %v2691_v59 = vpop.f32.mrb[28].mxu0 }
 0x459   : > { %v2693_v0 = vpop.f32.mrb[29].mxu0 }
 0x45c   : > { %v2697_v1 = vpop.f32.mrb[30].mxu0 }
 0x45d   : > { %v2699_v32 = vpop.f32.mrb[31].mxu0 }
 0x460   : > { %v2703_v21 = vpop.f32.mrb[32].mxu0 }
 0x461   : > { %v2705_v45 = vpop.f32.mrb[33].mxu0 }
 0x464   : > { %v2709_v30 = vpop.f32.mrb[34].mxu0 }
 0x465   : > { %v2711_v20 = vpop.f32.mrb[35].mxu0 }
 0x468   : > { %v2715_v61 = vpop.f32.mrb[36].mxu0 }
 0x469   : > { %v2717_v34 = vpop.f32.mrb[37].mxu0 }
 0x470   : > { %v6170_v48 = vpop.f32.mrb[38].mxu0 }
 0x471   : > { %v6172_v60 = vpop.f32.mrb[39].mxu0 }
 0x48d   : > { %v3005_v15 = vpop.f32.mrb[30].mxu1 }
 0x48e   : > { %v4436_v50 = vadd.f32 %v3005_v15, %v2691_v59  ;;  %v3007_v58 = vpop.f32.mrb[31].mxu1 }
 0x48f   : > { %v4437_v54 = vadd.f32 %v3007_v58, %v2693_v0 }
 0x490   : > { %v3064_v52 = vadd.f32 %v4436_v50, %v6179_v31 }
 0x491   : > { %v3065_v53 = vadd.f32 %v4437_v54, %v6183_v51  ;;  %v3011_v16 = vpop.f32.mrb[32].mxu1 }
 0x492   : > { %v4438_v55 = vadd.f32 %v3011_v16, %v2697_v1  ;;  %v3013_v57 = vpop.f32.mrb[33].mxu1  ;;  %v3088_v56 = vmul.f32 0.01, %v3064_v52  ;;  %vm3076_vm12 = vcmp.gt.f32.partialorder %v3064_v52, 0.0 }
 0x493   : > { %v4439_v44 = vadd.f32 %v3013_v57, %v2699_v32  ;;  %v3089_v39 = vmul.f32 0.01, %v3065_v53  ;;  %vm3077_vm13 = vcmp.gt.f32.partialorder %v3065_v53, 0.0 }
 0x494   : > { %v3066_v24 = vadd.f32 %v4438_v55, %v6179_v31  ;;  %v3100_v3 = vsel %vm3076_vm12, %v3064_v52, %v3088_v56 }
 0x495   : > { %v3067_v62 = vadd.f32 %v4439_v44, %v6183_v51  ;;  %v3017_v26 = vpop.f32.mrb[34].mxu1  ;;  %v3101_v25 = vsel %vm3077_vm13, %v3065_v53, %v3089_v39 }
 0x496   : > { %vm3078_vm14 = vcmp.gt.f32.partialorder %v3066_v24, 0.0  ;;  %v3090_v28 = vmul.f32 0.01, %v3066_v24  ;;  %v4440_v14 = vadd.f32 %v3017_v26, %v2703_v21  ;;  %v3019_v63 = vpop.f32.mrb[35].mxu1 }
 0x497   : > { %vm3079_vm15 = vcmp.gt.f32.partialorder %v3067_v62, 0.0  ;;  %v3091_v22 = vmul.f32 0.01, %v3067_v62  ;;  %v4441_v2 = vadd.f32 %v3019_v63, %v2705_v45  ;;  %v3118_v45 = vadd.s32 40, %v5743_v47 }
 0x498   : > { %v3102_v29 = vsel %vm3078_vm14, %v3066_v24, %v3090_v28  ;;  %v3068_v9 = vadd.f32 %v4440_v14, %v6179_v31 }
 0x499   : > { %v3137_v33 = vadd.f32 %v3102_v29, %v3100_v3  ;;  %v3103_v7 = vsel %vm3079_vm15, %v3067_v62, %v3091_v22  ;;  %v3069_v13 = vadd.f32 %v4441_v2, %v6183_v51  ;;  %v3023_v6 = vpop.f32.mrb[36].mxu1  ;;  %vm3124_vm7 = vcmp.lt.s32.totalorder %v3118_v45, 42 }
 0x49a   : > { %v3148_v4 = vadd.f32 %v3103_v7, %v3101_v25  ;;  %vm3080_vm0 = vcmp.gt.f32.partialorder %v3068_v9, 0.0  ;;  %v3092_v5 = vmul.f32 0.01, %v3068_v9  ;;  %v4442_v11 = vadd.f32 %v3023_v6, %v2709_v30  ;;  %v3025_v35 = vpop.f32.mrb[37].mxu1 }
 0x49b   : > { %vm3081_vm2 = vcmp.gt.f32.partialorder %v3069_v13, 0.0  ;;  %v3093_v8 = vmul.f32 0.01, %v3069_v13  ;;  %v4443_v40 = vadd.f32 %v3025_v35, %v2711_v20 }
 0x49c   : > { %v3104_v41 = vsel %vm3080_vm0, %v3068_v9, %v3092_v5  ;;  %v3070_v12 = vadd.f32 %v4442_v11, %v6179_v31 }
 0x49d   : > { %v3138_v18 = vadd.f32 %v3137_v33, %v3104_v41  ;;  %v3105_v49 = vsel %vm3081_vm2, %v3069_v13, %v3093_v8  ;;  %v3071_v19 = vadd.f32 %v4443_v40, %v6183_v51  ;;  %v3029_v36 = vpop.f32.mrb[38].mxu1 }
 0x49e   : > { %v3149_v38 = vadd.f32 %v3148_v4, %v3105_v49  ;;  %vm3082_vm3 = vcmp.gt.f32.partialorder %v3070_v12, 0.0  ;;  %v3094_v10 = vmul.f32 0.01, %v3070_v12  ;;  %v4444_v42 = vadd.f32 %v3029_v36, %v2715_v61  ;;  %v3031_v43 = vpop.f32.mrb[39].mxu1 }
 0x49f   : > { %vm3083_vm4 = vcmp.gt.f32.partialorder %v3071_v19, 0.0  ;;  %v3095_v27 = vmul.f32 0.01, %v3071_v19  ;;  %v4445_v37 = vadd.f32 %v3031_v43, %v2717_v34 }
 0x4a0   : > { %v3106_v46 = vsel %vm3082_vm3, %v3070_v12, %v3094_v10  ;;  %v3072_v59 = vadd.f32 %v4444_v42, %v6179_v31 }
 0x4a1   : > { %v3139_v0 = vadd.f32 %v3138_v18, %v3106_v46  ;;  %v3107_v1 = vsel %vm3083_vm4, %v3071_v19, %v3095_v27  ;;  %v3073_v32 = vadd.f32 %v4445_v37, %v6183_v51  ;;  %v3035_v21 = vpop.f32.mrb[40].mxu1 }
 0x4a2   : > { %v3150_v30 = vadd.f32 %v3149_v38, %v3107_v1  ;;  %vm3084_vm1 = vcmp.gt.f32.partialorder %v3072_v59, 0.0  ;;  %v3096_v20 = vmul.f32 0.01, %v3072_v59  ;;  %v4446_v17 = vadd.f32 %v3035_v21, %v6170_v48  ;;  %v3037_v61 = vpop.f32.mrb[41].mxu1 }
 0x4a3   : > { %vm3085_vm5 = vcmp.gt.f32.partialorder %v3073_v32, 0.0  ;;  %v3097_v15 = vmul.f32 0.01, %v3073_v32  ;;  %v4447_v34 = vadd.f32 %v3037_v61, %v6172_v60 }
 0x4a4   : > { %v3108_v50 = vsel %vm3084_vm1, %v3072_v59, %v3096_v20  ;;  %v3074_v58 = vadd.f32 %v4446_v17, %v6179_v31 }
 0x4a5   : > { %v3140_v54 = vadd.f32 %v3139_v0, %v3108_v50  ;;  %v3109_v52 = vsel %vm3085_vm5, %v3073_v32, %v3097_v15  ;;  %v3075_v53 = vadd.f32 %v4447_v34, %v6183_v51  ;;  %v4560_v51 = vmov 1966171168  }
 0x4a6   : > { %v3151_v16 = vadd.f32 %v3150_v30, %v3109_v52  ;;  %vm3086_vm6 = vcmp.gt.f32.partialorder %v3074_v58, 0.0  ;;  %v3098_v55 = vmul.f32 0.01, %v3074_v58  ;;  %v3165_v22 = vunpack.c.l.s4 %v4560_v51 }
 0x4a7   : > { %vm3087_vm8 = vcmp.gt.f32.partialorder %v3075_v53, 0.0  ;;  %v3099_v57 = vmul.f32 0.01, %v3075_v53 }
 0x4a8   : > { %v3110_v44 = vsel %vm3086_vm6, %v3074_v58, %v3098_v55  ;;  %v3166_v25 = vunpack.c.0.s8 %v3165_v22 }
 0x4a9   : > { %v3135_v48 = vsel %vm3124_vm7, %v3110_v44, 0.0  ;;  %v3111_v56 = vsel %vm3087_vm8, %v3075_v53, %v3099_v57 }
 0x4aa   : > { %v3141_v24 = vadd.f32 %v3140_v54, %v3135_v48  ;;  %v3136_v39 = vsel %vm3124_vm7, %v3111_v56, 0.0  ;;  %v3169_v4 = vsub.s32 %v3166_v25, %v5743_v47 }
 0x4ab   : > { %v3152_v62 = vadd.f32 %v3151_v16, %v3136_v39 }
 0x4ac   : > { %v3142_v60 = vrot.slane %v3141_v24, 4 }
 0x4ad   : > { %v3153_v26 = vrot.slane %v3152_v62, 4 }
 0x4ae   : > { %v3143_v28 = vadd.f32 %v3142_v60, %v3141_v24 }
 0x4af   : > { %v3154_v31 = vadd.f32 %v3153_v26, %v3152_v62 }
 0x4b0   : > { %v3144_v14 = vrot.slane %v3143_v28, 2 }
 0x4b1   : > { %v3155_v63 = vrot.slane %v3154_v31, 2 }
 0x4b2   : > { %v3145_v2 = vadd.f32 %v3144_v14, %v3143_v28 }
 0x4b3   : > { %v3156_v3 = vadd.f32 %v3155_v63, %v3154_v31 }
 0x4b4   : > { %v3146_v29 = vrot.slane %v3145_v2, 1 }
 0x4b5   : > { %v3157_v9 = vrot.slane %v3156_v3, 1 }
 0x4b6   : > { %v3147_v33 = vadd.f32 %v3146_v29, %v3145_v2 }
 0x4b7   : > { %v3158_v7 = vadd.f32 %v3157_v9, %v3156_v3 }
 0x4b8   : > { %v3159_v13 = vmul.f32 0.023809524, %v3147_v33 }
 0x4b9   : > { %v3160_v6 = vmul.f32 0.023809524, %v3158_v7 }
 0x4bb   : > { %v3163_v5 = vcombine.low %v3159_v13, %v3160_v6 }
 0x4bd   : > { %v3170_v11 = vrot.slane %v3163_v5, %v3169_v4 }
 0x4bf   : > { %v3177_v35 = vrot.slane %v3170_v11, %v3169_v4 }
 0x4c1   : > { %3183 = vst.msk [vmem:[%s377_s17] sm:$0x3] %vm3181_vm9, %v3177_v35 }
 0x4c2 PF: > { %s20_s13 = sadd.s32 1, %s4555_s13  }
 0x4c3   : > { %p17_p4 = scmp.ge.s32.totalorder %s20_s13, 4  }
 0x4c5   :  { %19 = sbr.rel (!%p17_p4) target bundleno = 1 (0x1), region = 103 }

</bundles_post_ra>
